<compile_context>
chip_gen: v7x
topology: tpu7x:2x2x1
jax: 0.10.0
libtpu: 0.0.40
codegen_flags: <defaults>
</compile_context>

<pallas_src>
import numpy as np
import jax
import jax.numpy as jnp
from jax.experimental import pallas as pl
from jax.experimental.pallas import tpu as pltpu

# ------------------ hyperparameters (consistent small config) ------------------
CHANNEL = 8
IMG = 7                       # input h = w = img_size
D = 3                         # depthwise window along the channel axis
SPE_HEAD = 9
SHARE_HEAD = 9
PADSIZE = 9                   # == sqrt(SPE_HEAD * SHARE_HEAD)
SPE_SIDE = 3                  # spe_head_Sidelength
PAD1 = D // 2
PAD_SPACE = PADSIZE - IMG
PAD_START = PAD_SPACE // 2
HW = IMG * IMG
KS = int(SHARE_HEAD ** 0.5)   # unfold kernel size (3)
DIL = int(SPE_HEAD ** 0.5)    # unfold dilation (3)
LH = PADSIZE - DIL * (KS - 1)  # unfold positions per spatial dim (3)
F = PADSIZE * PADSIZE         # flattened 9x9 frame (lane axis, 81)
N_HID = SPE_HEAD * SHARE_HEAD  # 81
CP2 = CHANNEL + 2 * PAD1      # channel-padded rows (10)
BN_EPS = 1e-5
BATCH = 2

assert LH * LH == SPE_HEAD and PADSIZE % SPE_SIDE == 0


# =========================== fused Pallas kernel ===========================

def semca_fused_kernel(xf_ref, xs_ref, wkf_ref, bkf_ref, wkscr_ref, bkscr_ref,
                       w1q_ref, w1k_ref, bnb_ref, w2s_ref, b2s_ref,
                       wv_ref, bv_ref, sh_ref, vmask_ref, out_ref):
    """Whole SeMCA forward for one batch element; all intermediates stay in VMEM."""
    xf = xf_ref[0]                                     # (C+2, 81) channel-padded input frame

    # --- key branch: depthwise Conv1d over channels, directly in the padded frame.
    # wk/bk are pre-embedded into the 9x9 frame (zero in the pad region), so this
    # equals k1_pad exactly.
    k1 = (wkf_ref[0:1, :] * xf[0:CHANNEL, :]
          + wkf_ref[1:2, :] * xf[1:CHANNEL + 1, :]
          + wkf_ref[2:3, :] * xf[2:CHANNEL + 2, :]
          + bkf_ref[...])                              # (C, 81)

    # --- attention embedding: unfold + torch's raw reshape are folded into the
    # pre-gathered xs input and permuted / BN-folded weights, so the grouped-conv
    # MLP becomes two lane-dense (8,81)x(81,81) matmuls.
    xsb = xs_ref[0]                                    # (D, C, 81)
    qt = xsb[PAD1]                                     # Q~^T  (C, 81)
    kt = (wkscr_ref[0] * xsb[0] + wkscr_ref[1] * xsb[1]
          + wkscr_ref[2] * xsb[2] + bkscr_ref[...])    # K~^T  (C, 81)
    h = (jnp.dot(qt, w1q_ref[...], preferred_element_type=jnp.float32)
         + jnp.dot(kt, w1k_ref[...], preferred_element_type=jnp.float32)
         + bnb_ref[...])
    h = jnp.maximum(h, 0.0)                            # (C, 81)
    # per-depth attention logits broadcast to every frame position
    # (the repeat/permute/reshape gymnastics are folded into w2s / b2s)
    l0 = jnp.dot(h, w2s_ref[0], preferred_element_type=jnp.float32) + b2s_ref[0]
    l1 = jnp.dot(h, w2s_ref[1], preferred_element_type=jnp.float32) + b2s_ref[1]
    l2 = jnp.dot(h, w2s_ref[2], preferred_element_type=jnp.float32) + b2s_ref[2]

    # --- value branch: depthwise 3x3 conv as 9 lane-shift matmuls in the frame.
    acc = wv_ref[:, 0:1] * jnp.dot(xf, sh_ref[0], preferred_element_type=jnp.float32)
    for tap in range(1, KS * KS):
        acc = acc + wv_ref[:, tap:tap + 1] * jnp.dot(
            xf, sh_ref[tap], preferred_element_type=jnp.float32)
    vfp = vmask_ref[...] * (acc + bv_ref[...])         # (C+2, 81) == channel-padded pad_v

    # --- softmax over d, weighted sum over the channel window, residual.
    m = jnp.maximum(l0, jnp.maximum(l1, l2))
    e0 = jnp.exp(l0 - m)
    e1 = jnp.exp(l1 - m)
    e2 = jnp.exp(l2 - m)
    num = (e0 * vfp[0:CHANNEL, :] + e1 * vfp[1:CHANNEL + 1, :]
           + e2 * vfp[2:CHANNEL + 2, :])
    inv = pl.reciprocal(e0 + e1 + e2, approx=True)
    out_ref[0] = num * inv + k1                        # lane-dense (C, 81) store


# =========================== pallas_call wrapper ===========================

def semca_forward(x, params):
    bs = x.shape[0]
    # frame-flatten + pad the input (trivial static XLA data movement)
    xq = jnp.pad(x, ((0, 0), (0, 0), (0, PAD_SPACE), (0, PAD_SPACE)))
    xf = jnp.pad(xq.reshape(bs, CHANNEL, F), ((0, 0), (PAD1, PAD1), (0, 0)))  # (bs, C+2, 81)
    # pre-gather the scrambled unfold operands (static indices, ~15 KB)
    xs = xf[:, params["chan_idx"], params["lane_idx"]]                        # (bs, D, C, 81)

    out81 = pl.pallas_call(
        semca_fused_kernel,
        out_shape=jax.ShapeDtypeStruct((bs, CHANNEL, F), jnp.float32),
        grid=(bs,),
        in_specs=[
            pl.BlockSpec((1, CP2, F), lambda b: (b, 0, 0)),            # xf
            pl.BlockSpec((1, D, CHANNEL, F), lambda b: (b, 0, 0, 0)),  # xs
            pl.BlockSpec((D, F), lambda b: (0, 0)),                    # wk (frame)
            pl.BlockSpec((1, F), lambda b: (0, 0)),                    # bk (frame)
            pl.BlockSpec((D, CHANNEL, F), lambda b: (0, 0, 0)),        # wk (scrambled)
            pl.BlockSpec((CHANNEL, F), lambda b: (0, 0)),              # bk (scrambled)
            pl.BlockSpec((N_HID, N_HID), lambda b: (0, 0)),            # W1q^T (BN-scaled)
            pl.BlockSpec((N_HID, N_HID), lambda b: (0, 0)),            # W1k^T (BN-scaled)
            pl.BlockSpec((1, N_HID), lambda b: (0, 0)),                # BN bias row
            pl.BlockSpec((D, N_HID, F), lambda b: (0, 0, 0)),          # W2^T @ S_d
            pl.BlockSpec((D, 1, F), lambda b: (0, 0, 0)),              # b2 @ S_d
            pl.BlockSpec((CP2, KS * KS), lambda b: (0, 0)),            # value conv taps
            pl.BlockSpec((CP2, 1), lambda b: (0, 0)),                  # value conv bias
            pl.BlockSpec((KS * KS, F, F), lambda b: (0, 0, 0)),        # lane-shift matrices
            pl.BlockSpec((1, F), lambda b: (0, 0)),                    # pad_v frame mask
        ],
        out_specs=pl.BlockSpec((1, CHANNEL, F), lambda b: (b, 0, 0)),
        compiler_params=pltpu.CompilerParams(
            dimension_semantics=("parallel",)),
    )(xf, xs, params["wk_f"], params["bk_f"], params["wkscr"], params["bkscr"],
      params["w1qT"], params["w1kT"], params["bn_bias"], params["w2s"],
      params["b2s"], params["wv_ext"], params["bv_ext"], params["shift"],
      params["vmask"])

    out = out81.reshape(bs, CHANNEL, PADSIZE, PADSIZE)
    return out[:, :, PAD_START:PAD_START + IMG, PAD_START:PAD_START + IMG]


# =========================== parameter preparation ===========================

def _block_diag(w):
    """(G, out, in) group weights -> (G*out, G*in) block-diagonal matrix."""
    g, o, i = w.shape
    bd = np.zeros((g * o, g * i), np.float32)
    for gi in range(g):
        bd[gi * o:(gi + 1) * o, gi * i:(gi + 1) * i] = w[gi]
    return bd


def make_params():
    keys = jax.random.split(jax.random.PRNGKey(0), 10)

    # ---- raw module parameters (deterministic) ----
    wk = np.asarray(0.3 * jax.random.normal(keys[0], (HW, D), jnp.float32))
    bk = np.asarray(0.1 * jax.random.normal(keys[1], (HW,), jnp.float32))
    w1_g = np.asarray(0.3 * jax.random.normal(
        keys[2], (SPE_HEAD, SHARE_HEAD, 2 * SHARE_HEAD), jnp.float32))
    gamma = np.asarray(1.0 + 0.1 * jax.random.normal(keys[3], (N_HID,), jnp.float32))
    beta = np.asarray(0.1 * jax.random.normal(keys[4], (N_HID,), jnp.float32))
    running_mean = np.zeros((N_HID,), np.float32)
    running_var = np.ones((N_HID,), np.float32)
    w2_g = np.asarray(0.3 * jax.random.normal(keys[5], (SPE_HEAD, D, SHARE_HEAD), jnp.float32))
    b2 = np.asarray(0.1 * jax.random.normal(keys[6], (SPE_HEAD * D,), jnp.float32))
    wv = np.asarray(0.3 * jax.random.normal(keys[7], (CHANNEL, KS, KS), jnp.float32))
    bv = np.asarray(0.1 * jax.random.normal(keys[8], (CHANNEL,), jnp.float32))

    # ---- embed per-pixel Conv1d params into the flattened 9x9 frame ----
    hw_to_frame = (np.arange(HW) // IMG) * PADSIZE + (np.arange(HW) % IMG)
    wk_f = np.zeros((D, F), np.float32)
    wk_f[:, hw_to_frame] = wk.T
    bk_f = np.zeros((1, F), np.float32)
    bk_f[0, hw_to_frame] = bk

    # ---- indices reproducing Unfold + torch's raw (9,2,72)->(162,8) reshape ----
    lane_idx = np.zeros((CHANNEL, F), np.int32)
    chan_base = np.zeros((CHANNEL, F), np.int32)
    for c2 in range(CHANNEL):
        for l in range(SPE_HEAD):
            a, b = divmod(l, LH)
            for i in range(SHARE_HEAD):
                j = CHANNEL * i + c2
                c, uv = divmod(j, SHARE_HEAD)
                u, v = divmod(uv, KS)
                m = l * SHARE_HEAD + i
                lane_idx[c2, m] = (a + DIL * u) * PADSIZE + (b + DIL * v)
                chan_base[c2, m] = c
    chan_idx = chan_base[None, :, :] + np.arange(D, dtype=np.int32)[:, None, None]

    # scrambled Conv1d weights/bias so K~^T is formed element-wise in-kernel
    wkscr = wk_f[:, lane_idx]                 # (D, C, F)
    bkscr = bk_f[0, lane_idx]                 # (C, F)

    # ---- attention_embed: block-diag weights, q/k column split, eval-BN fold ----
    # TODO(synk): training-mode BatchNorm (batch statistics) not implemented.
    w1_bd = _block_diag(w1_g)                 # (81, 162)
    w1q = np.zeros((N_HID, N_HID), np.float32)
    w1k = np.zeros((N_HID, N_HID), np.float32)
    for l in range(SPE_HEAD):
        base = l * 2 * SHARE_HEAD
        w1q[:, l * SHARE_HEAD:(l + 1) * SHARE_HEAD] = w1_bd[:, base:base + SHARE_HEAD]
        w1k[:, l * SHARE_HEAD:(l + 1) * SHARE_HEAD] = w1_bd[:, base + SHARE_HEAD:base + 2 * SHARE_HEAD]
    inv_std = gamma / np.sqrt(running_var + BN_EPS)
    bn_bias = (beta - running_mean * inv_std)[None, :].astype(np.float32)
    w1qT = (w1q.T * inv_std[None, :]).astype(np.float32)
    w1kT = (w1k.T * inv_std[None, :]).astype(np.float32)

    w2_bd = _block_diag(w2_g)                 # (27, 81)
    w2T = w2_bd.T.astype(np.float32)          # (81, 27)
    # attention after the repeat/permute/reshape gymnastics is 3x3-periodic over
    # the 9x9 frame -> fold the per-position selection into W2 / b2.
    pos = np.arange(F)
    lp = SPE_SIDE * ((pos // PADSIZE) % SPE_SIDE) + ((pos % PADSIZE) % SPE_SIDE)
    w2s = np.stack([w2T[:, lp * D + d] for d in range(D)]).astype(np.float32)      # (D, 81, F)
    b2s = np.stack([b2[lp * D + d] for d in range(D)])[:, None, :].astype(np.float32)  # (D, 1, F)

    # ---- value conv: channel-extended taps, lane-shift matrices, frame mask ----
    wv_ext = np.zeros((CP2, KS * KS), np.float32)
    wv_ext[PAD1:PAD1 + CHANNEL] = wv.reshape(CHANNEL, KS * KS)
    bv_ext = np.zeros((CP2, 1), np.float32)
    bv_ext[PAD1:PAD1 + CHANNEL, 0] = bv
    shift = np.zeros((KS * KS, F, F), np.float32)
    for u in range(KS):
        for v in range(KS):
            s = (KS - u) * PADSIZE + (KS - v)
            p = np.arange(F - s)
            shift[u * KS + v, p, p + s] = 1.0
    vmask = ((pos // PADSIZE >= PAD_SPACE) &
             (pos % PADSIZE >= PAD_SPACE)).astype(np.float32)[None, :]

    params = {
        "wk_f": jnp.asarray(wk_f), "bk_f": jnp.asarray(bk_f),
        "wkscr": jnp.asarray(wkscr), "bkscr": jnp.asarray(bkscr),
        "w1qT": jnp.asarray(w1qT), "w1kT": jnp.asarray(w1kT),
        "bn_bias": jnp.asarray(bn_bias),
        "w2s": jnp.asarray(w2s), "b2s": jnp.asarray(b2s),
        "wv_ext": jnp.asarray(wv_ext), "bv_ext": jnp.asarray(bv_ext),
        "shift": jnp.asarray(shift), "vmask": jnp.asarray(vmask),
        "chan_idx": jnp.asarray(chan_idx), "lane_idx": jnp.asarray(lane_idx),
    }
    return params, keys[9]


if __name__ == "__main__":
    params, xkey = make_params()
    x = jax.random.normal(xkey, (BATCH, CHANNEL, IMG, IMG), jnp.float32)

    fwd = jax.jit(lambda xx: semca_forward(xx, params))
    out = fwd(x)
    jax.block_until_ready(out)

    assert out.shape == (BATCH, CHANNEL, IMG, IMG), out.shape
    assert bool(jnp.isfinite(out).all())
    print("KERNEL_OK")
</pallas_src>

<mosaic_0001>
module attributes {stable_mosaic.version = 11 : i64} {
  func.func @semca_fused_kernel(%arg0: i32, %arg1: memref<1x10x81xf32, #tpu.memory_space<vmem>>, %arg2: memref<1x3x8x81xf32, #tpu.memory_space<vmem>>, %arg3: memref<3x81xf32, #tpu.memory_space<vmem>>, %arg4: memref<1x81xf32, #tpu.memory_space<vmem>>, %arg5: memref<3x8x81xf32, #tpu.memory_space<vmem>>, %arg6: memref<8x81xf32, #tpu.memory_space<vmem>>, %arg7: memref<81x81xf32, #tpu.memory_space<vmem>>, %arg8: memref<81x81xf32, #tpu.memory_space<vmem>>, %arg9: memref<1x81xf32, #tpu.memory_space<vmem>>, %arg10: memref<3x81x81xf32, #tpu.memory_space<vmem>>, %arg11: memref<3x1x81xf32, #tpu.memory_space<vmem>>, %arg12: memref<10x9xf32, #tpu.memory_space<vmem>>, %arg13: memref<10x1xf32, #tpu.memory_space<vmem>>, %arg14: memref<9x81x81xf32, #tpu.memory_space<vmem>>, %arg15: memref<1x81xf32, #tpu.memory_space<vmem>>, %arg16: memref<1x8x81xf32, #tpu.memory_space<vmem>>) attributes {dimension_semantics = [#tpu.dimension_semantics<parallel>], iteration_bounds = array<i64: 2>, scalar_prefetch = 0 : i64, scratch_operands = 0 : i64, tpu.core_type = #tpu.core_type<tc>, window_params = [{transform_indices = @transform_0, window_bounds = array<i64: 1, 10, 81>}, {transform_indices = @transform_1, window_bounds = array<i64: 1, 3, 8, 81>}, {pipeline_mode = #tpu.pipeline_mode<synchronous>, transform_indices = @transform_2, window_bounds = array<i64: 3, 81>}, {pipeline_mode = #tpu.pipeline_mode<synchronous>, transform_indices = @transform_3, window_bounds = array<i64: 1, 81>}, {pipeline_mode = #tpu.pipeline_mode<synchronous>, transform_indices = @transform_4, window_bounds = array<i64: 3, 8, 81>}, {pipeline_mode = #tpu.pipeline_mode<synchronous>, transform_indices = @transform_5, window_bounds = array<i64: 8, 81>}, {pipeline_mode = #tpu.pipeline_mode<synchronous>, transform_indices = @transform_6, window_bounds = array<i64: 81, 81>}, {pipeline_mode = #tpu.pipeline_mode<synchronous>, transform_indices = @transform_7, window_bounds = array<i64: 81, 81>}, {pipeline_mode = #tpu.pipeline_mode<synchronous>, transform_indices = @transform_8, window_bounds = array<i64: 1, 81>}, {pipeline_mode = #tpu.pipeline_mode<synchronous>, transform_indices = @transform_9, window_bounds = array<i64: 3, 81, 81>}, {pipeline_mode = #tpu.pipeline_mode<synchronous>, transform_indices = @transform_10, window_bounds = array<i64: 3, 1, 81>}, {pipeline_mode = #tpu.pipeline_mode<synchronous>, transform_indices = @transform_11, window_bounds = array<i64: 10, 9>}, {pipeline_mode = #tpu.pipeline_mode<synchronous>, transform_indices = @transform_12, window_bounds = array<i64: 10, 1>}, {pipeline_mode = #tpu.pipeline_mode<synchronous>, transform_indices = @transform_13, window_bounds = array<i64: 9, 81, 81>}, {pipeline_mode = #tpu.pipeline_mode<synchronous>, transform_indices = @transform_14, window_bounds = array<i64: 1, 81>}, {transform_indices = @transform_15, window_bounds = array<i64: 1, 8, 81>}]} {
    %c0 = arith.constant 0 : index
    %c0_0 = arith.constant 0 : index
    %c0_1 = arith.constant 0 : index
    %0 = vector.load %arg1[%c0, %c0_0, %c0_1] : memref<1x10x81xf32, #tpu.memory_space<vmem>>, vector<1x10x81xf32>
    %1 = vector.shape_cast %0 : vector<1x10x81xf32> to vector<10x81xf32>
    %c0_2 = arith.constant 0 : index
    %c0_3 = arith.constant 0 : index
    %2 = vector.load %arg3[%c0_2, %c0_3] : memref<3x81xf32, #tpu.memory_space<vmem>>, vector<1x81xf32>
    %3 = vector.extract_strided_slice %1 {offsets = [0, 0], sizes = [8, 81], strides = [1, 1]} : vector<10x81xf32> to vector<8x81xf32>
    %4 = vector.broadcast %2 : vector<1x81xf32> to vector<8x81xf32>
    %5 = arith.mulf %4, %3 : vector<8x81xf32>
    %c1 = arith.constant 1 : index
    %c0_4 = arith.constant 0 : index
    %6 = vector.load %arg3[%c1, %c0_4] : memref<3x81xf32, #tpu.memory_space<vmem>>, vector<1x81xf32>
    %7 = vector.extract_strided_slice %1 {offsets = [1, 0], sizes = [8, 81], strides = [1, 1]} : vector<10x81xf32> to vector<8x81xf32>
    %8 = vector.broadcast %6 : vector<1x81xf32> to vector<8x81xf32>
    %9 = arith.mulf %8, %7 : vector<8x81xf32>
    %10 = arith.addf %5, %9 : vector<8x81xf32>
    %c2 = arith.constant 2 : index
    %c0_5 = arith.constant 0 : index
    %11 = vector.load %arg3[%c2, %c0_5] : memref<3x81xf32, #tpu.memory_space<vmem>>, vector<1x81xf32>
    %12 = vector.extract_strided_slice %1 {offsets = [2, 0], sizes = [8, 81], strides = [1, 1]} : vector<10x81xf32> to vector<8x81xf32>
    %13 = vector.broadcast %11 : vector<1x81xf32> to vector<8x81xf32>
    %14 = arith.mulf %13, %12 : vector<8x81xf32>
    %15 = arith.addf %10, %14 : vector<8x81xf32>
    %c0_6 = arith.constant 0 : index
    %c0_7 = arith.constant 0 : index
    %16 = vector.load %arg4[%c0_6, %c0_7] : memref<1x81xf32, #tpu.memory_space<vmem>>, vector<1x81xf32>
    %17 = vector.broadcast %16 : vector<1x81xf32> to vector<8x81xf32>
    %18 = arith.addf %15, %17 : vector<8x81xf32>
    %c0_8 = arith.constant 0 : index
    %c0_9 = arith.constant 0 : index
    %c0_10 = arith.constant 0 : index
    %c0_11 = arith.constant 0 : index
    %19 = vector.load %arg2[%c0_8, %c0_9, %c0_10, %c0_11] : memref<1x3x8x81xf32, #tpu.memory_space<vmem>>, vector<1x3x8x81xf32>
    %20 = vector.shape_cast %19 : vector<1x3x8x81xf32> to vector<3x8x81xf32>
    %21 = vector.extract_strided_slice %20 {offsets = [1, 0, 0], sizes = [1, 8, 81], strides = [1, 1, 1]} : vector<3x8x81xf32> to vector<1x8x81xf32>
    %22 = vector.shape_cast %21 : vector<1x8x81xf32> to vector<8x81xf32>
    %c0_12 = arith.constant 0 : index
    %c0_13 = arith.constant 0 : index
    %c0_14 = arith.constant 0 : index
    %23 = vector.load %arg5[%c0_12, %c0_13, %c0_14] : memref<3x8x81xf32, #tpu.memory_space<vmem>>, vector<1x8x81xf32>
    %24 = vector.shape_cast %23 : vector<1x8x81xf32> to vector<8x81xf32>
    %25 = vector.extract_strided_slice %20 {offsets = [0, 0, 0], sizes = [1, 8, 81], strides = [1, 1, 1]} : vector<3x8x81xf32> to vector<1x8x81xf32>
    %26 = vector.shape_cast %25 : vector<1x8x81xf32> to vector<8x81xf32>
    %27 = arith.mulf %24, %26 : vector<8x81xf32>
    %c1_15 = arith.constant 1 : index
    %c0_16 = arith.constant 0 : index
    %c0_17 = arith.constant 0 : index
    %28 = vector.load %arg5[%c1_15, %c0_16, %c0_17] : memref<3x8x81xf32, #tpu.memory_space<vmem>>, vector<1x8x81xf32>
    %29 = vector.shape_cast %28 : vector<1x8x81xf32> to vector<8x81xf32>
    %30 = vector.extract_strided_slice %20 {offsets = [1, 0, 0], sizes = [1, 8, 81], strides = [1, 1, 1]} : vector<3x8x81xf32> to vector<1x8x81xf32>
    %31 = vector.shape_cast %30 : vector<1x8x81xf32> to vector<8x81xf32>
    %32 = arith.mulf %29, %31 : vector<8x81xf32>
    %33 = arith.addf %27, %32 : vector<8x81xf32>
    %c2_18 = arith.constant 2 : index
    %c0_19 = arith.constant 0 : index
    %c0_20 = arith.constant 0 : index
    %34 = vector.load %arg5[%c2_18, %c0_19, %c0_20] : memref<3x8x81xf32, #tpu.memory_space<vmem>>, vector<1x8x81xf32>
    %35 = vector.shape_cast %34 : vector<1x8x81xf32> to vector<8x81xf32>
    %36 = vector.extract_strided_slice %20 {offsets = [2, 0, 0], sizes = [1, 8, 81], strides = [1, 1, 1]} : vector<3x8x81xf32> to vector<1x8x81xf32>
    %37 = vector.shape_cast %36 : vector<1x8x81xf32> to vector<8x81xf32>
    %38 = arith.mulf %35, %37 : vector<8x81xf32>
    %39 = arith.addf %33, %38 : vector<8x81xf32>
    %c0_21 = arith.constant 0 : index
    %c0_22 = arith.constant 0 : index
    %40 = vector.load %arg6[%c0_21, %c0_22] : memref<8x81xf32, #tpu.memory_space<vmem>>, vector<8x81xf32>
    %41 = arith.addf %39, %40 : vector<8x81xf32>
    %c0_23 = arith.constant 0 : index
    %c0_24 = arith.constant 0 : index
    %42 = vector.load %arg7[%c0_23, %c0_24] : memref<81x81xf32, #tpu.memory_space<vmem>>, vector<81x81xf32>
    %cst = arith.constant dense<0.000000e+00> : vector<8x81xf32>
    %43 = tpu.matmul %22, %42, %cst {dimension_numbers = #tpu.dot_dimension_numbers<[1], [0], [0], [1], [0, 0, 1, 1], [], []>} : vector<8x81xf32>, vector<81x81xf32>, vector<8x81xf32> -> vector<8x81xf32>
    %c0_25 = arith.constant 0 : index
    %c0_26 = arith.constant 0 : index
    %44 = vector.load %arg8[%c0_25, %c0_26] : memref<81x81xf32, #tpu.memory_space<vmem>>, vector<81x81xf32>
    %cst_27 = arith.constant dense<0.000000e+00> : vector<8x81xf32>
    %45 = tpu.matmul %41, %44, %cst_27 {dimension_numbers = #tpu.dot_dimension_numbers<[1], [0], [0], [1], [0, 0, 1, 1], [], []>} : vector<8x81xf32>, vector<81x81xf32>, vector<8x81xf32> -> vector<8x81xf32>
    %46 = arith.addf %43, %45 : vector<8x81xf32>
    %c0_28 = arith.constant 0 : index
    %c0_29 = arith.constant 0 : index
    %47 = vector.load %arg9[%c0_28, %c0_29] : memref<1x81xf32, #tpu.memory_space<vmem>>, vector<1x81xf32>
    %48 = vector.broadcast %47 : vector<1x81xf32> to vector<8x81xf32>
    %49 = arith.addf %46, %48 : vector<8x81xf32>
    %cst_30 = arith.constant 0.000000e+00 : f32
    %50 = vector.broadcast %cst_30 : f32 to vector<8x81xf32>
    %51 = arith.maximumf %49, %50 : vector<8x81xf32>
    %c0_31 = arith.constant 0 : index
    %c0_32 = arith.constant 0 : index
    %c0_33 = arith.constant 0 : index
    %52 = vector.load %arg10[%c0_31, %c0_32, %c0_33] : memref<3x81x81xf32, #tpu.memory_space<vmem>>, vector<1x81x81xf32>
    %53 = vector.shape_cast %52 : vector<1x81x81xf32> to vector<81x81xf32>
    %cst_34 = arith.constant dense<0.000000e+00> : vector<8x81xf32>
    %54 = tpu.matmul %51, %53, %cst_34 {dimension_numbers = #tpu.dot_dimension_numbers<[1], [0], [0], [1], [0, 0, 1, 1], [], []>} : vector<8x81xf32>, vector<81x81xf32>, vector<8x81xf32> -> vector<8x81xf32>
    %c0_35 = arith.constant 0 : index
    %c0_36 = arith.constant 0 : index
    %c0_37 = arith.constant 0 : index
    %55 = vector.load %arg11[%c0_35, %c0_36, %c0_37] : memref<3x1x81xf32, #tpu.memory_space<vmem>>, vector<1x1x81xf32>
    %56 = vector.shape_cast %55 : vector<1x1x81xf32> to vector<1x81xf32>
    %57 = vector.broadcast %56 : vector<1x81xf32> to vector<8x81xf32>
    %58 = arith.addf %54, %57 : vector<8x81xf32>
    %c1_38 = arith.constant 1 : index
    %c0_39 = arith.constant 0 : index
    %c0_40 = arith.constant 0 : index
    %59 = vector.load %arg10[%c1_38, %c0_39, %c0_40] : memref<3x81x81xf32, #tpu.memory_space<vmem>>, vector<1x81x81xf32>
    %60 = vector.shape_cast %59 : vector<1x81x81xf32> to vector<81x81xf32>
    %cst_41 = arith.constant dense<0.000000e+00> : vector<8x81xf32>
    %61 = tpu.matmul %51, %60, %cst_41 {dimension_numbers = #tpu.dot_dimension_numbers<[1], [0], [0], [1], [0, 0, 1, 1], [], []>} : vector<8x81xf32>, vector<81x81xf32>, vector<8x81xf32> -> vector<8x81xf32>
    %c1_42 = arith.constant 1 : index
    %c0_43 = arith.constant 0 : index
    %c0_44 = arith.constant 0 : index
    %62 = vector.load %arg11[%c1_42, %c0_43, %c0_44] : memref<3x1x81xf32, #tpu.memory_space<vmem>>, vector<1x1x81xf32>
    %63 = vector.shape_cast %62 : vector<1x1x81xf32> to vector<1x81xf32>
    %64 = vector.broadcast %63 : vector<1x81xf32> to vector<8x81xf32>
    %65 = arith.addf %61, %64 : vector<8x81xf32>
    %c2_45 = arith.constant 2 : index
    %c0_46 = arith.constant 0 : index
    %c0_47 = arith.constant 0 : index
    %66 = vector.load %arg10[%c2_45, %c0_46, %c0_47] : memref<3x81x81xf32, #tpu.memory_space<vmem>>, vector<1x81x81xf32>
    %67 = vector.shape_cast %66 : vector<1x81x81xf32> to vector<81x81xf32>
    %cst_48 = arith.constant dense<0.000000e+00> : vector<8x81xf32>
    %68 = tpu.matmul %51, %67, %cst_48 {dimension_numbers = #tpu.dot_dimension_numbers<[1], [0], [0], [1], [0, 0, 1, 1], [], []>} : vector<8x81xf32>, vector<81x81xf32>, vector<8x81xf32> -> vector<8x81xf32>
    %c2_49 = arith.constant 2 : index
    %c0_50 = arith.constant 0 : index
    %c0_51 = arith.constant 0 : index
    %69 = vector.load %arg11[%c2_49, %c0_50, %c0_51] : memref<3x1x81xf32, #tpu.memory_space<vmem>>, vector<1x1x81xf32>
    %70 = vector.shape_cast %69 : vector<1x1x81xf32> to vector<1x81xf32>
    %71 = vector.broadcast %70 : vector<1x81xf32> to vector<8x81xf32>
    %72 = arith.addf %68, %71 : vector<8x81xf32>
    %c0_52 = arith.constant 0 : index
    %c0_53 = arith.constant 0 : index
    %73 = vector.load %arg12[%c0_52, %c0_53] : memref<10x9xf32, #tpu.memory_space<vmem>>, vector<10x1xf32>
    %c0_54 = arith.constant 0 : index
    %c0_55 = arith.constant 0 : index
    %c0_56 = arith.constant 0 : index
    %74 = vector.load %arg14[%c0_54, %c0_55, %c0_56] : memref<9x81x81xf32, #tpu.memory_space<vmem>>, vector<1x81x81xf32>
    %75 = vector.shape_cast %74 : vector<1x81x81xf32> to vector<81x81xf32>
    %cst_57 = arith.constant dense<0.000000e+00> : vector<10x81xf32>
    %76 = tpu.matmul %1, %75, %cst_57 {dimension_numbers = #tpu.dot_dimension_numbers<[1], [0], [0], [1], [0, 0, 1, 1], [], []>} : vector<10x81xf32>, vector<81x81xf32>, vector<10x81xf32> -> vector<10x81xf32>
    %77 = vector.broadcast %73 : vector<10x1xf32> to vector<10x81xf32>
    %78 = arith.mulf %77, %76 : vector<10x81xf32>
    %c0_58 = arith.constant 0 : index
    %c1_59 = arith.constant 1 : index
    %79 = vector.load %arg12[%c0_58, %c1_59] : memref<10x9xf32, #tpu.memory_space<vmem>>, vector<10x1xf32>
    %c1_60 = arith.constant 1 : index
    %c0_61 = arith.constant 0 : index
    %c0_62 = arith.constant 0 : index
    %80 = vector.load %arg14[%c1_60, %c0_61, %c0_62] : memref<9x81x81xf32, #tpu.memory_space<vmem>>, vector<1x81x81xf32>
    %81 = vector.shape_cast %80 : vector<1x81x81xf32> to vector<81x81xf32>
    %cst_63 = arith.constant dense<0.000000e+00> : vector<10x81xf32>
    %82 = tpu.matmul %1, %81, %cst_63 {dimension_numbers = #tpu.dot_dimension_numbers<[1], [0], [0], [1], [0, 0, 1, 1], [], []>} : vector<10x81xf32>, vector<81x81xf32>, vector<10x81xf32> -> vector<10x81xf32>
    %83 = vector.broadcast %79 : vector<10x1xf32> to vector<10x81xf32>
    %84 = arith.mulf %83, %82 : vector<10x81xf32>
    %85 = arith.addf %78, %84 : vector<10x81xf32>
    %c0_64 = arith.constant 0 : index
    %c2_65 = arith.constant 2 : index
    %86 = vector.load %arg12[%c0_64, %c2_65] : memref<10x9xf32, #tpu.memory_space<vmem>>, vector<10x1xf32>
    %c2_66 = arith.constant 2 : index
    %c0_67 = arith.constant 0 : index
    %c0_68 = arith.constant 0 : index
    %87 = vector.load %arg14[%c2_66, %c0_67, %c0_68] : memref<9x81x81xf32, #tpu.memory_space<vmem>>, vector<1x81x81xf32>
    %88 = vector.shape_cast %87 : vector<1x81x81xf32> to vector<81x81xf32>
    %cst_69 = arith.constant dense<0.000000e+00> : vector<10x81xf32>
    %89 = tpu.matmul %1, %88, %cst_69 {dimension_numbers = #tpu.dot_dimension_numbers<[1], [0], [0], [1], [0, 0, 1, 1], [], []>} : vector<10x81xf32>, vector<81x81xf32>, vector<10x81xf32> -> vector<10x81xf32>
    %90 = vector.broadcast %86 : vector<10x1xf32> to vector<10x81xf32>
    %91 = arith.mulf %90, %89 : vector<10x81xf32>
    %92 = arith.addf %85, %91 : vector<10x81xf32>
    %c0_70 = arith.constant 0 : index
    %c3 = arith.constant 3 : index
    %93 = vector.load %arg12[%c0_70, %c3] : memref<10x9xf32, #tpu.memory_space<vmem>>, vector<10x1xf32>
    %c3_71 = arith.constant 3 : index
    %c0_72 = arith.constant 0 : index
    %c0_73 = arith.constant 0 : index
    %94 = vector.load %arg14[%c3_71, %c0_72, %c0_73] : memref<9x81x81xf32, #tpu.memory_space<vmem>>, vector<1x81x81xf32>
    %95 = vector.shape_cast %94 : vector<1x81x81xf32> to vector<81x81xf32>
    %cst_74 = arith.constant dense<0.000000e+00> : vector<10x81xf32>
    %96 = tpu.matmul %1, %95, %cst_74 {dimension_numbers = #tpu.dot_dimension_numbers<[1], [0], [0], [1], [0, 0, 1, 1], [], []>} : vector<10x81xf32>, vector<81x81xf32>, vector<10x81xf32> -> vector<10x81xf32>
    %97 = vector.broadcast %93 : vector<10x1xf32> to vector<10x81xf32>
    %98 = arith.mulf %97, %96 : vector<10x81xf32>
    %99 = arith.addf %92, %98 : vector<10x81xf32>
    %c0_75 = arith.constant 0 : index
    %c4 = arith.constant 4 : index
    %100 = vector.load %arg12[%c0_75, %c4] : memref<10x9xf32, #tpu.memory_space<vmem>>, vector<10x1xf32>
    %c4_76 = arith.constant 4 : index
    %c0_77 = arith.constant 0 : index
    %c0_78 = arith.constant 0 : index
    %101 = vector.load %arg14[%c4_76, %c0_77, %c0_78] : memref<9x81x81xf32, #tpu.memory_space<vmem>>, vector<1x81x81xf32>
    %102 = vector.shape_cast %101 : vector<1x81x81xf32> to vector<81x81xf32>
    %cst_79 = arith.constant dense<0.000000e+00> : vector<10x81xf32>
    %103 = tpu.matmul %1, %102, %cst_79 {dimension_numbers = #tpu.dot_dimension_numbers<[1], [0], [0], [1], [0, 0, 1, 1], [], []>} : vector<10x81xf32>, vector<81x81xf32>, vector<10x81xf32> -> vector<10x81xf32>
    %104 = vector.broadcast %100 : vector<10x1xf32> to vector<10x81xf32>
    %105 = arith.mulf %104, %103 : vector<10x81xf32>
    %106 = arith.addf %99, %105 : vector<10x81xf32>
    %c0_80 = arith.constant 0 : index
    %c5 = arith.constant 5 : index
    %107 = vector.load %arg12[%c0_80, %c5] : memref<10x9xf32, #tpu.memory_space<vmem>>, vector<10x1xf32>
    %c5_81 = arith.constant 5 : index
    %c0_82 = arith.constant 0 : index
    %c0_83 = arith.constant 0 : index
    %108 = vector.load %arg14[%c5_81, %c0_82, %c0_83] : memref<9x81x81xf32, #tpu.memory_space<vmem>>, vector<1x81x81xf32>
    %109 = vector.shape_cast %108 : vector<1x81x81xf32> to vector<81x81xf32>
    %cst_84 = arith.constant dense<0.000000e+00> : vector<10x81xf32>
    %110 = tpu.matmul %1, %109, %cst_84 {dimension_numbers = #tpu.dot_dimension_numbers<[1], [0], [0], [1], [0, 0, 1, 1], [], []>} : vector<10x81xf32>, vector<81x81xf32>, vector<10x81xf32> -> vector<10x81xf32>
    %111 = vector.broadcast %107 : vector<10x1xf32> to vector<10x81xf32>
    %112 = arith.mulf %111, %110 : vector<10x81xf32>
    %113 = arith.addf %106, %112 : vector<10x81xf32>
    %c0_85 = arith.constant 0 : index
    %c6 = arith.constant 6 : index
    %114 = vector.load %arg12[%c0_85, %c6] : memref<10x9xf32, #tpu.memory_space<vmem>>, vector<10x1xf32>
    %c6_86 = arith.constant 6 : index
    %c0_87 = arith.constant 0 : index
    %c0_88 = arith.constant 0 : index
    %115 = vector.load %arg14[%c6_86, %c0_87, %c0_88] : memref<9x81x81xf32, #tpu.memory_space<vmem>>, vector<1x81x81xf32>
    %116 = vector.shape_cast %115 : vector<1x81x81xf32> to vector<81x81xf32>
    %cst_89 = arith.constant dense<0.000000e+00> : vector<10x81xf32>
    %117 = tpu.matmul %1, %116, %cst_89 {dimension_numbers = #tpu.dot_dimension_numbers<[1], [0], [0], [1], [0, 0, 1, 1], [], []>} : vector<10x81xf32>, vector<81x81xf32>, vector<10x81xf32> -> vector<10x81xf32>
    %118 = vector.broadcast %114 : vector<10x1xf32> to vector<10x81xf32>
    %119 = arith.mulf %118, %117 : vector<10x81xf32>
    %120 = arith.addf %113, %119 : vector<10x81xf32>
    %c0_90 = arith.constant 0 : index
    %c7 = arith.constant 7 : index
    %121 = vector.load %arg12[%c0_90, %c7] : memref<10x9xf32, #tpu.memory_space<vmem>>, vector<10x1xf32>
    %c7_91 = arith.constant 7 : index
    %c0_92 = arith.constant 0 : index
    %c0_93 = arith.constant 0 : index
    %122 = vector.load %arg14[%c7_91, %c0_92, %c0_93] : memref<9x81x81xf32, #tpu.memory_space<vmem>>, vector<1x81x81xf32>
    %123 = vector.shape_cast %122 : vector<1x81x81xf32> to vector<81x81xf32>
    %cst_94 = arith.constant dense<0.000000e+00> : vector<10x81xf32>
    %124 = tpu.matmul %1, %123, %cst_94 {dimension_numbers = #tpu.dot_dimension_numbers<[1], [0], [0], [1], [0, 0, 1, 1], [], []>} : vector<10x81xf32>, vector<81x81xf32>, vector<10x81xf32> -> vector<10x81xf32>
    %125 = vector.broadcast %121 : vector<10x1xf32> to vector<10x81xf32>
    %126 = arith.mulf %125, %124 : vector<10x81xf32>
    %127 = arith.addf %120, %126 : vector<10x81xf32>
    %c0_95 = arith.constant 0 : index
    %c8 = arith.constant 8 : index
    %128 = vector.load %arg12[%c0_95, %c8] : memref<10x9xf32, #tpu.memory_space<vmem>>, vector<10x1xf32>
    %c8_96 = arith.constant 8 : index
    %c0_97 = arith.constant 0 : index
    %c0_98 = arith.constant 0 : index
    %129 = vector.load %arg14[%c8_96, %c0_97, %c0_98] : memref<9x81x81xf32, #tpu.memory_space<vmem>>, vector<1x81x81xf32>
    %130 = vector.shape_cast %129 : vector<1x81x81xf32> to vector<81x81xf32>
    %cst_99 = arith.constant dense<0.000000e+00> : vector<10x81xf32>
    %131 = tpu.matmul %1, %130, %cst_99 {dimension_numbers = #tpu.dot_dimension_numbers<[1], [0], [0], [1], [0, 0, 1, 1], [], []>} : vector<10x81xf32>, vector<81x81xf32>, vector<10x81xf32> -> vector<10x81xf32>
    %132 = vector.broadcast %128 : vector<10x1xf32> to vector<10x81xf32>
    %133 = arith.mulf %132, %131 : vector<10x81xf32>
    %134 = arith.addf %127, %133 : vector<10x81xf32>
    %c0_100 = arith.constant 0 : index
    %c0_101 = arith.constant 0 : index
    %135 = vector.load %arg15[%c0_100, %c0_101] : memref<1x81xf32, #tpu.memory_space<vmem>>, vector<1x81xf32>
    %c0_102 = arith.constant 0 : index
    %c0_103 = arith.constant 0 : index
    %136 = vector.load %arg13[%c0_102, %c0_103] : memref<10x1xf32, #tpu.memory_space<vmem>>, vector<10x1xf32>
    %137 = vector.broadcast %136 : vector<10x1xf32> to vector<10x81xf32>
    %138 = arith.addf %134, %137 : vector<10x81xf32>
    %139 = vector.broadcast %135 : vector<1x81xf32> to vector<10x81xf32>
    %140 = arith.mulf %139, %138 : vector<10x81xf32>
    %141 = arith.maximumf %65, %72 : vector<8x81xf32>
    %142 = arith.maximumf %58, %141 : vector<8x81xf32>
    %143 = arith.subf %58, %142 : vector<8x81xf32>
    %144 = math.exp %143 : vector<8x81xf32>
    %145 = arith.subf %65, %142 : vector<8x81xf32>
    %146 = math.exp %145 : vector<8x81xf32>
    %147 = arith.subf %72, %142 : vector<8x81xf32>
    %148 = math.exp %147 : vector<8x81xf32>
    %149 = vector.extract_strided_slice %140 {offsets = [0, 0], sizes = [8, 81], strides = [1, 1]} : vector<10x81xf32> to vector<8x81xf32>
    %150 = arith.mulf %144, %149 : vector<8x81xf32>
    %151 = vector.extract_strided_slice %140 {offsets = [1, 0], sizes = [8, 81], strides = [1, 1]} : vector<10x81xf32> to vector<8x81xf32>
    %152 = arith.mulf %146, %151 : vector<8x81xf32>
    %153 = arith.addf %150, %152 : vector<8x81xf32>
    %154 = vector.extract_strided_slice %140 {offsets = [2, 0], sizes = [8, 81], strides = [1, 1]} : vector<10x81xf32> to vector<8x81xf32>
    %155 = arith.mulf %148, %154 : vector<8x81xf32>
    %156 = arith.addf %153, %155 : vector<8x81xf32>
    %157 = arith.addf %144, %146 : vector<8x81xf32>
    %158 = arith.addf %157, %148 : vector<8x81xf32>
    %159 = tpu.reciprocal %158 {approx = true} : vector<8x81xf32> -> vector<8x81xf32>
    %160 = arith.mulf %156, %159 : vector<8x81xf32>
    %161 = arith.addf %160, %18 : vector<8x81xf32>
    %c0_104 = arith.constant 0 : index
    %c0_105 = arith.constant 0 : index
    %c0_106 = arith.constant 0 : index
    %162 = vector.load %arg16[%c0_104, %c0_105, %c0_106] : memref<1x8x81xf32, #tpu.memory_space<vmem>>, vector<1x8x81xf32>
    %163 = vector.shape_cast %162 : vector<1x8x81xf32> to vector<8x81xf32>
    %164 = vector.shape_cast %161 : vector<8x81xf32> to vector<1x8x81xf32>
    tpu.vector_store %arg16[%c0_104, %c0_105, %c0_106], %164 {strides = array<i32>} : memref<1x8x81xf32, #tpu.memory_space<vmem>>, vector<1x8x81xf32>,
    return
  }
  func.func @transform_0(%arg0: i32) -> (i32, i32, i32) {
    %c0_i32 = arith.constant 0 : i32
    %c0_i32_0 = arith.constant 0 : i32
    %c0_i32_1 = arith.constant 0 : i32
    return %arg0, %c0_i32, %c0_i32_0 : i32, i32, i32
  }
  func.func @transform_1(%arg0: i32) -> (i32, i32, i32, i32) {
    %c0_i32 = arith.constant 0 : i32
    %c0_i32_0 = arith.constant 0 : i32
    %c0_i32_1 = arith.constant 0 : i32
    %c0_i32_2 = arith.constant 0 : i32
    return %arg0, %c0_i32, %c0_i32_0, %c0_i32_1 : i32, i32, i32, i32
  }
  func.func @transform_2(%arg0: i32) -> (i32, i32) {
    %c0_i32 = arith.constant 0 : i32
    %c0_i32_0 = arith.constant 0 : i32
    %c0_i32_1 = arith.constant 0 : i32
    return %c0_i32, %c0_i32_0 : i32, i32
  }
  func.func @transform_3(%arg0: i32) -> (i32, i32) {
    %c0_i32 = arith.constant 0 : i32
    %c0_i32_0 = arith.constant 0 : i32
    %c0_i32_1 = arith.constant 0 : i32
    return %c0_i32, %c0_i32_0 : i32, i32
  }
  func.func @transform_4(%arg0: i32) -> (i32, i32, i32) {
    %c0_i32 = arith.constant 0 : i32
    %c0_i32_0 = arith.constant 0 : i32
    %c0_i32_1 = arith.constant 0 : i32
    %c0_i32_2 = arith.constant 0 : i32
    return %c0_i32, %c0_i32_0, %c0_i32_1 : i32, i32, i32
  }
  func.func @transform_5(%arg0: i32) -> (i32, i32) {
    %c0_i32 = arith.constant 0 : i32
    %c0_i32_0 = arith.constant 0 : i32
    %c0_i32_1 = arith.constant 0 : i32
    return %c0_i32, %c0_i32_0 : i32, i32
  }
  func.func @transform_6(%arg0: i32) -> (i32, i32) {
    %c0_i32 = arith.constant 0 : i32
    %c0_i32_0 = arith.constant 0 : i32
    %c0_i32_1 = arith.constant 0 : i32
    return %c0_i32, %c0_i32_0 : i32, i32
  }
  func.func @transform_7(%arg0: i32) -> (i32, i32) {
    %c0_i32 = arith.constant 0 : i32
    %c0_i32_0 = arith.constant 0 : i32
    %c0_i32_1 = arith.constant 0 : i32
    return %c0_i32, %c0_i32_0 : i32, i32
  }
  func.func @transform_8(%arg0: i32) -> (i32, i32) {
    %c0_i32 = arith.constant 0 : i32
    %c0_i32_0 = arith.constant 0 : i32
    %c0_i32_1 = arith.constant 0 : i32
    return %c0_i32, %c0_i32_0 : i32, i32
  }
  func.func @transform_9(%arg0: i32) -> (i32, i32, i32) {
    %c0_i32 = arith.constant 0 : i32
    %c0_i32_0 = arith.constant 0 : i32
    %c0_i32_1 = arith.constant 0 : i32
    %c0_i32_2 = arith.constant 0 : i32
    return %c0_i32, %c0_i32_0, %c0_i32_1 : i32, i32, i32
  }
  func.func @transform_10(%arg0: i32) -> (i32, i32, i32) {
    %c0_i32 = arith.constant 0 : i32
    %c0_i32_0 = arith.constant 0 : i32
    %c0_i32_1 = arith.constant 0 : i32
    %c0_i32_2 = arith.constant 0 : i32
    return %c0_i32, %c0_i32_0, %c0_i32_1 : i32, i32, i32
  }
  func.func @transform_11(%arg0: i32) -> (i32, i32) {
    %c0_i32 = arith.constant 0 : i32
    %c0_i32_0 = arith.constant 0 : i32
    %c0_i32_1 = arith.constant 0 : i32
    return %c0_i32, %c0_i32_0 : i32, i32
  }
  func.func @transform_12(%arg0: i32) -> (i32, i32) {
    %c0_i32 = arith.constant 0 : i32
    %c0_i32_0 = arith.constant 0 : i32
    %c0_i32_1 = arith.constant 0 : i32
    return %c0_i32, %c0_i32_0 : i32, i32
  }
  func.func @transform_13(%arg0: i32) -> (i32, i32, i32) {
    %c0_i32 = arith.constant 0 : i32
    %c0_i32_0 = arith.constant 0 : i32
    %c0_i32_1 = arith.constant 0 : i32
    %c0_i32_2 = arith.constant 0 : i32
    return %c0_i32, %c0_i32_0, %c0_i32_1 : i32, i32, i32
  }
  func.func @transform_14(%arg0: i32) -> (i32, i32) {
    %c0_i32 = arith.constant 0 : i32
    %c0_i32_0 = arith.constant 0 : i32
    %c0_i32_1 = arith.constant 0 : i32
    return %c0_i32, %c0_i32_0 : i32, i32
  }
  func.func @transform_15(%arg0: i32) -> (i32, i32, i32) {
    %c0_i32 = arith.constant 0 : i32
    %c0_i32_0 = arith.constant 0 : i32
    %c0_i32_1 = arith.constant 0 : i32
    return %arg0, %c0_i32, %c0_i32_0 : i32, i32, i32
  }
}

</mosaic_0001>

<bundles_post_ra>
// kernel: _lambda_.1
= control target key start
LH: loop header
LB: loop body
LE: loop exit
PB: predicated region body
PF: predicated region fallthrough
CT: control target
= control target key end

     0   :  { %s3183_s18 = smov 0   ;;  %s3892_s0 = inlined_call_operand.vmem [shape: f32[2,10,81], index: 0, kind: input, shape index: {}]   ;;  %s3893_s1 = inlined_call_operand.vmem [shape: f32[2,3,8,81], index: 1, kind: input, shape index: {}]   ;;  %s3894_s2 = inlined_call_operand.vmem [shape: f32[3,81], index: 2, kind: input, shape index: {}]   ;;  %s3895_s3 = inlined_call_operand.vmem [shape: f32[1,81], index: 3, kind: input, shape index: {}]   ;;  %s3896_s4 = inlined_call_operand.vmem [shape: f32[3,8,81], index: 4, kind: input, shape index: {}]   ;;  %s3897_s5 = inlined_call_operand.vmem [shape: f32[8,81], index: 5, kind: input, shape index: {}]   ;;  %s3898_s6 = inlined_call_operand.vmem [shape: f32[81,81], index: 6, kind: input, shape index: {}]   ;;  %s3899_s7 = inlined_call_operand.vmem [shape: f32[81,81], index: 7, kind: input, shape index: {}]   ;;  %s3900_s8 = inlined_call_operand.vmem [shape: f32[1,81], index: 8, kind: input, shape index: {}]   ;;  %s3901_s9 = inlined_call_operand.vmem [shape: f32[3,81,81], index: 9, kind: input, shape index: {}]   ;;  %s3902_s10 = inlined_call_operand.vmem [shape: f32[3,1,81], index: 10, kind: input, shape index: {}]   ;;  %s3903_s11 = inlined_call_operand.vmem [shape: f32[10,9], index: 11, kind: input, shape index: {}]   ;;  %s3904_s12 = inlined_call_operand.vmem [shape: f32[10,1], index: 12, kind: input, shape index: {}]   ;;  %s3905_s13 = inlined_call_operand.vmem [shape: f32[9,81,81], index: 13, kind: input, shape index: {}]   ;;  %s3906_s14 = inlined_call_operand.vmem [shape: f32[1,81], index: 14, kind: input, shape index: {}]   ;;  %s3907_s15 = inlined_call_operand.vmem [shape: f32[2,8,81], index: 15, kind: output, shape index: {}]  }
   0x1 LB: > { %s2084_s19 = sadd.s32 4294967295, %s3089_s18   ;;  %p2088_p0 = scmp.ge.s32.totalorder %s3089_s18, 1  ;;  %s3089_s18 = sphi %s3183_s18, %s25_s18  }
   0x2   : > { %p447_p1 = scmp.lt.s32.totalorder %s3089_s18, 3 }
   0x4   : > { %p448_p2 = pnand %p2088_p0, %p447_p1 }
   0x5   : > { %v585_v0 = vld [vmem:[%s3899_s7] sm:$0xff] (!%p448_p2)  ;;  %v586_v1 = vld [vmem:[%s3899_s7 + $0x8] sm:$0xff] (!%p448_p2)  ;;  %v3091_v3 = vmov (!%p448_p2), 0.0|0.0   ;;  %v587_v6 = vld [vmem:[%s3899_s7 + $0x10] sm:$0xff] (!%p448_p2)  ;;  %p499_p3 = scmp.lt.s32.totalorder (!%p448_p2), %s2084_s19, 1  ;;  %vm3092_vm0 = vmmov (!%p448_p2), 0  }
   0x6   : > { %451 = sbr.rel (%p448_p2) target bundleno = 595 (0x253), region = 80  ;;  %v574_v2 = vld [vmem:[%s3898_s6] sm:$0xff] (!%p448_p2)  ;;  %2783 = vmatprep.subr.bf16.mxu0 (!%p448_p2), %v3091_v3  ;;  %2798 = vmatprep.subr.bf16.mxu1 (!%p448_p2), %v3091_v3  ;;  %v2784_v4 = vpack.c.bf16 (!%p448_p2), %v586_v1, %v585_v0  ;;  %v575_v5 = vld [vmem:[%s3898_s6 + $0x8] sm:$0xff] (!%p448_p2)  ;;  %v588_v7 = vld [vmem:[%s3899_s7 + $0x18] sm:$0xff] (!%p448_p2)  ;;  %v3093_v11 = vmov (!%p448_p2), 0.0   ;;  %vm600_vm1 = vcmask (!%p448_p2), 1040384  }
   0x7   : > { %v2799_v8 = vpack.c.bf16 (!%p448_p2), %v575_v5, %v574_v2  ;;  %v576_v9 = vld [vmem:[%s3898_s6 + $0x10] sm:$0xff] (!%p448_p2)  ;;  %v577_v10 = vld [vmem:[%s3898_s6 + $0x18] sm:$0xff] (!%p448_p2)  ;;  %2455 = vmatprep.mubr.msk.f32.mxu0 (!%p448_p2), %vm3092_vm0, %v3093_v11  ;;  %2480 = vmatprep.mubr.msk.f32.mxu1 (!%p448_p2), %vm3092_vm0, %v3093_v11  ;;  %v2787_v12 = vpack.c.bf16 (!%p448_p2), %v588_v7, %v587_v6  ;;  %v589_v14 = vld [vmem:[%s3899_s7 + $0x20] sm:$0xff] (!%p448_p2)  ;;  %vm596_vm2 = vcmask (!%p448_p2), 662528   ;;  %vm530_vm3 = vcmask (!%p448_p2), 1046528  }
   0x8   : > { %2785 = vmatpush3.bf16.msra.mxu0 (!%p448_p2), %v2784_v4  ;;  %v2802_v13 = vpack.c.bf16 (!%p448_p2), %v577_v10, %v576_v9  ;;  %v590_v15 = vld [vmem:[%s3899_s7 + $0x28] sm:$0xff] (!%p448_p2)  ;;  %v578_v16 = vld [vmem:[%s3898_s6 + $0x20] sm:$0xff] (!%p448_p2)  ;;  %v591_v18 = vld [vmem:[%s3899_s7 + $0x30] sm:$0xff] (!%p448_p2)  ;;  %vm545_vm4 = vcmask (!%p448_p2), 1045504  }
   0x9   : > { %2800 = vmatpush3.bf16.msra.mxu1 (!%p448_p2), %v2799_v8  ;;  %2786 = vmatprep.subr.bf16.mxu0 (!%p448_p2), %v3091_v3  ;;  %v579_v17 = vld [vmem:[%s3898_s6 + $0x28] sm:$0xff] (!%p448_p2)  ;;  %v2790_v19 = vpack.c.bf16 (!%p448_p2), %v590_v15, %v589_v14  ;;  %v592_v20 = vld [vmem:[%s3899_s7 + $0x38] sm:$0xff] (!%p448_p2)  ;;  %v580_v21 = vld [vmem:[%s3898_s6 + $0x30] sm:$0xff] (!%p448_p2) }
   0xa   : > { %2801 = vmatprep.subr.bf16.mxu1 (!%p448_p2), %v3091_v3  ;;  %v581_v22 = vld [vmem:[%s3898_s6 + $0x38] sm:$0xff] (!%p448_p2)  ;;  %v2805_v23 = vpack.c.bf16 (!%p448_p2), %v579_v17, %v578_v16  ;;  %v562_v27 = vld [vmem:[%s3896_s4] sm:$0xff] (!%p448_p2)  ;;  %v2097_v28 = vld [vmem:[%s3896_s4 + $0x8] sm:$0xff] (!%p448_p2)  ;;  %v2793_v32 = vpack.c.bf16 (!%p448_p2), %v592_v20, %v591_v18 }
   0xb   : > { %v2098_v29 = vld [vmem:[%s3896_s4 + $0x10] sm:$0xff] (!%p448_p2)  ;;  %v2808_v33 = vpack.c.bf16 (!%p448_p2), %v581_v22, %v580_v21  ;;  %v593_v34 = vld [vmem:[%s3899_s7 + $0x40] sm:$0xff] (!%p448_p2)  ;;  %v594_v35 = vld [vmem:[%s3899_s7 + $0x48] sm:$0xff] (!%p448_p2)  ;;  %v3094_v21 = vmov (!%p448_p2), 0  }
   0xc   : > { %2788 = vmatpush3.bf16.msra.mxu0 (!%p448_p2), %v2787_v12  ;;  %v582_v38 = vld [vmem:[%s3898_s6 + $0x40] sm:$0xff] (!%p448_p2)  ;;  %v583_v39 = vld [vmem:[%s3898_s6 + $0x48] sm:$0xff] (!%p448_p2)  ;;  %v2796_v40 = vpack.c.bf16 (!%p448_p2), %v594_v35, %v593_v34  ;;  %v595_v46 = vld [vmem:[%s3899_s7 + $0x50] sm:$0x1] (!%p448_p2)  ;;  %3059 = vset.pattern.permute.xlu0 (!%p448_p2), %v3094_v21 }
   0xd   : > { %s3909_s19 = smov (!%p499_p3, %s2084_s19), 1  ;;  %2803 = vmatpush3.bf16.msra.mxu1 %v2802_v13  ;;  %2789 = vmatprep.subr.bf16.mxu0 %v3091_v3  ;;  %v2811_v41 = vpack.c.bf16 %v583_v39, %v582_v38  ;;  %v572_v43 = vld [vmem:[%s3897_s5] sm:$0xff]  ;;  %v760_v45 = vld [vmem:[%s3901_s9 + $0x8] sm:$0xff]  ;;  %v2107_v48 = vld [vmem:[%s3901_s9 + $0x58] sm:$0xff] }
   0xe   : > { %s3038_s16 = smul.u32 24, %s3909_s19  ;;  %2804 = vmatprep.subr.bf16.mxu1 %v3091_v3  ;;  %v759_v44 = vld [vmem:[%s3901_s9] sm:$0xff]  ;;  %v584_v50 = vld [vmem:[%s3898_s6 + $0x50] sm:$0x1]  ;;  %v762_v54 = vld [vmem:[%s3901_s9 + $0x18] sm:$0xff]  ;;  %s2255_s26 = sshll.u32 %s3909_s19, 4 }
   0xf   : > { %v2108_v49 = vld [vmem:[%s3901_s9 + $0x60] sm:$0xff]  ;;  %v2814_v51 = vpack.c.bf16 %v760_v45, %v759_v44  ;;  %v761_v53 = vld [vmem:[%s3901_s9 + $0x10] sm:$0xff]  ;;  %v2109_v55 = vld [vmem:[%s3901_s9 + $0x68] sm:$0xff]  ;;  %s3425_s24 = scalar_lea.vmem %s3892_s0, %s2255_s26  ;;  %s2092_s23 = sshll.u32 %s3909_s19, 3 }
  0x10   : > { %s508_s29 = scalar_lea.vmem %s3893_s1, %s3038_s16  ;;  %2791 = vmatpush3.bf16.msra.mxu0 %v2790_v19  ;;  %v2829_v52 = vpack.c.bf16 %v2108_v49, %v2107_v48  ;;  %v2110_v56 = vld [vmem:[%s3901_s9 + $0x70] sm:$0xff]  ;;  %v2817_v57 = vpack.c.bf16 %v762_v54, %v761_v53  ;;  %v763_v59 = vld [vmem:[%s3901_s9 + $0x20] sm:$0xff]  ;;  %v764_v60 = vld [vmem:[%s3901_s9 + $0x28] sm:$0xff]  ;;  %s512_s27 = scalar_lea.vmem %s3907_s15, %s2092_s23 }
  0x11   : > { %v559_v24 = vld [vmem:[%s508_s29] sm:$0xff]  ;;  %v560_v25 = vld [vmem:[%s508_s29 + $0x8] sm:$0xff]  ;;  %v561_v26 = vld [vmem:[%s508_s29 + $0x10] sm:$0xff]  ;;  %2806 = vmatpush3.bf16.msra.mxu1 %v2805_v23  ;;  %2792 = vmatprep.subr.bf16.mxu0 %v3091_v3  ;;  %v2832_v58 = vpack.c.bf16 %v2110_v56, %v2109_v55  ;;  %v2820_v63 = vpack.c.bf16 %v764_v60, %v763_v59  ;;  %v3095_v23 = vmov 1   ;;  %v3100_v59 = vmov 4  }
  0x12   : > { %v563_v30 = vmul.f32 %v562_v27, %v559_v24  ;;  %v566_v31 = vmul.f32 %v2097_v28, %v560_v25  ;;  %v570_v37 = vmul.f32 %v2098_v29, %v561_v26  ;;  %2807 = vmatprep.subr.bf16.mxu1 %v3091_v3  ;;  %v2111_v61 = vld [vmem:[%s3901_s9 + $0x78] sm:$0xff]  ;;  %v2112_v62 = vld [vmem:[%s3901_s9 + $0x80] sm:$0xff]  ;;  %v765_v1 = vld [vmem:[%s3901_s9 + $0x30] sm:$0xff]  ;;  %3060 = vset.pattern.permute.xlu1 %v3095_v23  ;;  %v3096_v24 = vmov 2  }
  0x13   : > { %v2835_v0 = vpack.c.bf16 %v2112_v62, %v2111_v61  ;;  %v766_v2 = vld [vmem:[%s3901_s9 + $0x38] sm:$0xff]  ;;  %v2113_v4 = vld [vmem:[%s3901_s9 + $0x88] sm:$0xff]  ;;  %v2114_v5 = vld [vmem:[%s3901_s9 + $0x90] sm:$0xff] }
  0x14   : > { %v567_v36 = vadd.f32 %v566_v31, %v563_v30  ;;  %2794 = vmatpush3.bf16.msra.mxu0 %v2793_v32  ;;  %v2823_v6 = vpack.c.bf16 %v766_v2, %v765_v1  ;;  %v2838_v7 = vpack.c.bf16 %v2114_v5, %v2113_v4  ;;  %v767_v8 = vld [vmem:[%s3901_s9 + $0x40] sm:$0xff]  ;;  %v768_v9 = vld [vmem:[%s3901_s9 + $0x48] sm:$0xff]  ;;  %v2115_v12 = vld [vmem:[%s3901_s9 + $0x98] sm:$0xff] }
  0x15   : > { %2809 = vmatpush3.bf16.msra.mxu1 %v2808_v33  ;;  %2795 = vmatprep.subr.bf16.mxu0 %v3091_v3  ;;  %v2826_v10 = vpack.c.bf16 %v768_v9, %v767_v8  ;;  %v2116_v13 = vld [vmem:[%s3901_s9 + $0xa0] sm:$0xff]  ;;  %v769_v15 = vld [vmem:[%s3901_s9 + $0x50] sm:$0x1]  ;;  %v2117_v16 = vld [vmem:[%s3901_s9 + $0xa8] sm:$0x1] }
  0x16   : > { %v571_v42 = vadd.f32 %v570_v37, %v567_v36  ;;  %2810 = vmatprep.subr.bf16.mxu1 %v3091_v3  ;;  %v2841_v14 = vpack.c.bf16 %v2116_v13, %v2115_v12  ;;  %v1041_v17 = vld [vmem:[%s3905_s13] sm:$0xff]  ;;  %v1042_v18 = vld [vmem:[%s3905_s13 + $0x8] sm:$0xff]  ;;  %v2122_v32 = vld [vmem:[%s3901_s9 + $0xb0] sm:$0xff]  ;;  %v3098_v36 = vmov 5  }
  0x17   : > { %v2858_v19 = vpack.c.bf16 %v1042_v18, %v1041_v17  ;;  %v3389_v20 = vld [vmem:[%s3903_s11] sm:$0xff]  ;;  %v3396_v22 = vld [vmem:[%s3903_s11 + $0x8] sm:$0x3]  ;;  %v2123_v33 = vld [vmem:[%s3901_s9 + $0xb8] sm:$0xff] }
  0x18   : > { %2797 = vmatpush3.bf16.msra.mxu0 %v2796_v40  ;;  %v573_v47 = vadd.f32 %v572_v43, %v571_v42  ;;  %1138 = vperm.xlu0 %3059, %v3389_v20   ;;  %v2103_v28 = vld [vmem:[%s3900_s8] ss:$0 sm:$0xff]  ;;  %v1043_v34 = vld [vmem:[%s3905_s13 + $0x10] sm:$0xff]  ;;  %v1044_v35 = vld [vmem:[%s3905_s13 + $0x18] sm:$0xff]  ;;  %v2844_v38 = vpack.c.bf16 %v2123_v33, %v2122_v32 }
  0x19   : > { %2812 = vmatpush3.bf16.msra.mxu1 %v2811_v41  ;;  %2453 = vmatprep.subr.mxu0 %v3093_v11  ;;  %v2124_v40 = vld [vmem:[%s3901_s9 + $0xc0] sm:$0xff]  ;;  %v2125_v41 = vld [vmem:[%s3901_s9 + $0xc8] sm:$0xff]  ;;  %v2862_v42 = vpack.c.bf16 %v1044_v35, %v1043_v34  ;;  %v2127_v48 = vld [vmem:[%s3901_s9 + $0xd8] sm:$0xff] }
  0x1a   : > { %2478 = vmatprep.subr.mxu1 %v3093_v11  ;;  %1239 = vperm.xlu1 %3060, %v3389_v20   ;;  %v1045_v43 = vld [vmem:[%s3905_s13 + $0x20] sm:$0xff]  ;;  %v1046_v44 = vld [vmem:[%s3905_s13 + $0x28] sm:$0xff]  ;;  %v2130_v61 = vld [vmem:[%s3901_s9 + $0xf0] sm:$0xff] }
  0x1b   : > { %v3442_v45 = vld [vmem:[%s3425_s24] sm:$0xff]  ;;  %v2866_v49 = vpack.c.bf16 %v1046_v44, %v1045_v43  ;;  %v2129_v55 = vld [vmem:[%s3901_s9 + $0xe8] sm:$0xff]  ;;  %v2131_v62 = vld [vmem:[%s3901_s9 + $0xf8] sm:$0xff] }
  0x1c   : > { %2454 = vmatpush3.msk.msra.mxu0 %vm600_vm1, %v595_v46  ;;  %1143 = vperm.xlu0 %3059, %v3396_v22   ;;  %v2847_v46 = vpack.c.bf16 %v2125_v41, %v2124_v40  ;;  %v2128_v54 = vld [vmem:[%s3901_s9 + $0xe0] sm:$0xff]  ;;  %v2856_v1 = vpack.c.bf16 %v2131_v62, %v2130_v61  ;;  %v1051_v2 = vld [vmem:[%s3905_s13 + $0x50] sm:$0x1]  ;;  %v2140_v4 = vld [vmem:[%s3905_s13 + $0x58] sm:$0xff] }
  0x1d   : > { %2479 = vmatpush3.msk.msra.mxu1 %vm600_vm1, %v584_v50  ;;  %2456 = vmatmul.mubr.msk.f32.vlgmr.msra.gmra.mrb[0].mxu0 %vm596_vm2, %v573_v47  ;;  %v2126_v47 = vld [vmem:[%s3901_s9 + $0xd0] sm:$0xff]  ;;  %v2853_v60 = vpack.c.bf16 %v2129_v55, %v2128_v54  ;;  %v2141_v5 = vld [vmem:[%s3905_s13 + $0x60] sm:$0xff]  ;;  %v2142_v8 = vld [vmem:[%s3905_s13 + $0x68] sm:$0xff] }
  0x1e   : > { %2481 = vmatmul.mubr.msk.f32.vlgmr.msra.gmra.mrb[0].mxu1 %vm596_vm2, %v560_v25  ;;  %2813 = vmatprep.subr.bf16.mxu0 %v3091_v3  ;;  %v3097_v25 = vmov 3   ;;  %v1047_v50 = vld [vmem:[%s3905_s13 + $0x30] sm:$0xff]  ;;  %v2850_v53 = vpack.c.bf16 %v2127_v48, %v2126_v47  ;;  %v2878_v12 = vpack.c.bf16 %v2141_v5, %v2140_v4  ;;  %v2144_v17 = vld [vmem:[%s3905_s13 + $0x78] sm:$0xff]  ;;  %v2145_v18 = vld [vmem:[%s3905_s13 + $0x80] sm:$0xff] }
  0x1f   : > { %2815 = vmatpush3.bf16.msra.mxu0 %v2814_v51  ;;  %2828 = vmatprep.subr.bf16.mxu1 %v3091_v3  ;;  %v1048_v51 = vld [vmem:[%s3905_s13 + $0x38] sm:$0xff]  ;;  %v2143_v9 = vld [vmem:[%s3905_s13 + $0x70] sm:$0xff]  ;;  %v2149_v33 = vld [vmem:[%s3905_s13 + $0xa0] sm:$0xff] }
  0x20   : > { %2830 = vmatpush3.bf16.msra.mxu1 %v2829_v52  ;;  %2816 = vmatprep.subr.bf16.mxu0 %v3091_v3  ;;  %v3099_v52 = vmov 6   ;;  %v2870_v56 = vpack.c.bf16 %v1048_v51, %v1047_v50  ;;  %v2158_v23 = vld [vmem:[%s3905_s13 + $0xd0] sm:$0xff]  ;;  %v2148_v32 = vld [vmem:[%s3905_s13 + $0x98] sm:$0xff]  ;;  %v2150_v40 = vld [vmem:[%s3905_s13 + $0xa8] sm:$0x1] }
  0x21   : > { %2831 = vmatprep.subr.bf16.mxu1 %v3091_v3  ;;  %2505 = vmatprep.mubr.msk.f32.mxu0 %vm3092_vm0, %v3093_v11  ;;  %v2162_v35 = vld [vmem:[%s3905_s13 + $0xf0] sm:$0xff]  ;;  %v2168_v41 = vld [vmem:[%s3905_s13 + $0x108] sm:$0xff]  ;;  %v2182_v43 = vld [vmem:[%s3905_s13 + $0x160] sm:$0xff] }
  0x22   : > { %2530 = vmatprep.mubr.msk.f32.mxu1 %vm3092_vm0, %v3093_v11  ;;  %3061 = vset.pattern.permute.xlu0 %v3096_v24  ;;  %v2183_v44 = vld [vmem:[%s3905_s13 + $0x168] sm:$0xff]  ;;  %v2170_v47 = vld [vmem:[%s3905_s13 + $0x118] sm:$0xff]  ;;  %v2171_v48 = vld [vmem:[%s3905_s13 + $0x120] sm:$0xff] }
  0x23   : > { %2818 = vmatpush3.bf16.msra.mxu0 %v2817_v57  ;;  %1341 = vperm.xlu0 %3061, %v3389_v20   ;;  %v1049_v57 = vld [vmem:[%s3905_s13 + $0x40] sm:$0xff]  ;;  %v2185_v50 = vld [vmem:[%s3905_s13 + $0x178] sm:$0xff]  ;;  %v2938_v51 = vpack.c.bf16 %v2183_v44, %v2182_v43  ;;  %v2173_v54 = vld [vmem:[%s3905_s13 + $0x130] sm:$0xff] }
  0x24   : > { %2833 = vmatpush3.bf16.msra.mxu1 %v2832_v58  ;;  %2819 = vmatprep.subr.bf16.mxu0 %v3091_v3  ;;  %v1050_v58 = vld [vmem:[%s3905_s13 + $0x48] sm:$0xff]  ;;  %v1965_v61 = vld [vmem:[%s3904_s12] sm:$0xff]  ;;  %v2188_v62 = vld [vmem:[%s3905_s13 + $0x190] sm:$0xff] }
  0x25   : > { %2834 = vmatprep.subr.bf16.mxu1 %v3091_v3  ;;  %1243 = vperm.xlu1 %3060, %v3396_v22   ;;  %v2190_v5 = vld [vmem:[%s3905_s13 + $0x1a0] sm:$0xff]  ;;  %v2224_v43 = vld [vmem:[%s3905_s13 + $0x268] sm:$0xff]  ;;  %v2225_v44 = vld [vmem:[%s3905_s13 + $0x270] sm:$0xff] }
  0x27   : > { %2821 = vmatpush3.bf16.msra.mxu0 %v2820_v63  ;;  %3064 = vset.pattern.permute.xlu0 %v3097_v25  ;;  %v2874_v63 = vpack.c.bf16 %v1050_v58, %v1049_v57  ;;  %v2174_v58 = vld [vmem:[%s3905_s13 + $0x138] sm:$0xff] }
  0x28   : > { %2836 = vmatpush3.bf16.msra.mxu1 %v2835_v0  ;;  %2822 = vmatprep.subr.bf16.mxu0 %v3091_v3  ;;  %v3101_v0 = vmov 8  }
  0x29   : > { %2837 = vmatprep.subr.bf16.mxu1 %v3091_v3  ;;  %1447 = vperm.xlu0 %3064, %v3396_v22  }
  0x2a   : > { %3062 = vset.pattern.permute.xlu1 %v3096_v24  ;;  %v2159_v24 = vld [vmem:[%s3905_s13 + $0xd8] sm:$0xff] }
  0x2b   : > { %2824 = vmatpush3.bf16.msra.mxu0 %v2823_v6  ;;  %1345 = vperm.xlu1 %3062, %v3396_v22   ;;  %v2154_v6 = vld [vmem:[%s3905_s13 + $0xb0] sm:$0xff] }
  0x2c   : > { %2839 = vmatpush3.bf16.msra.mxu1 %v2838_v7  ;;  %2825 = vmatprep.subr.bf16.mxu0 %v3091_v3  ;;  %v1966_v7 = vld [vmem:[%s3904_s12 + $0x8] sm:$0x3] }
  0x2d   : > { %2840 = vmatprep.subr.bf16.mxu1 %v3091_v3  ;;  %3066 = vset.pattern.permute.xlu0 %v3098_v36 }
  0x2e   : > { %1647 = vperm.xlu0 %3066, %v3389_v20  }
  0x2f   : > { %2827 = vmatpush3.bf16.msra.mxu0 %v2826_v10  ;;  %3063 = vset.pattern.permute.xlu1 %v3097_v25  ;;  %v2132_v10 = vld [vmem:[%s3901_s9 + $0x100] sm:$0x1]  ;;  %v2886_v25 = vpack.c.bf16 %v2145_v18, %v2144_v17  ;;  %v2213_v18 = vld [vmem:[%s3905_s13 + $0x228] sm:$0xff] }
  0x30   : > { %2842 = vmatpush3.bf16.msra.mxu1 %v2841_v14  ;;  %2503 = vmatprep.subr.mxu0 %v3093_v11  ;;  %v2156_v14 = vld [vmem:[%s3905_s13 + $0xc0] sm:$0xff] }
  0x31   : > { %2528 = vmatprep.subr.mxu1 %v3093_v11  ;;  %1443 = vperm.xlu1 %3063, %v3389_v20   ;;  %v2212_v17 = vld [vmem:[%s3905_s13 + $0x220] sm:$0xff] }
  0x32   : > { %3069 = vset.pattern.permute.xlu0 %v3099_v52 }
  0x33   : > { %2504 = vmatpush3.msk.msra.mxu0 %vm600_vm1, %v769_v15  ;;  %1753 = vperm.xlu0 %3069, %v3396_v22   ;;  %v2157_v15 = vld [vmem:[%s3905_s13 + $0xc8] sm:$0xff] }
  0x34   : > { %2529 = vmatpush3.msk.msra.mxu1 %vm600_vm1, %v2117_v16  ;;  %2843 = vmatprep.subr.bf16.mxu0 %v3091_v3  ;;  %v3532_v16 = vld [vmem:[%s3425_s24 + $0x8] sm:$0x3] }
  0x35   : > { %2859 = vmatprep.subr.bf16.mxu1 %v2858_v19  ;;  %3065 = vset.pattern.permute.xlu1 %v3100_v59  ;;  %v2175_v59 = vld [vmem:[%s3905_s13 + $0x140] sm:$0xff] }
  0x36   : > { %1545 = vperm.xlu1 %3065, %v3389_v20  }
  0x37   : > { %3071 = vset.pattern.permute.xlu0 %v3101_v0 }
  0x38   : > { %1953 = vperm.xlu0 %3071, %v3389_v20  }
  0x3a   : > { %1549 = vperm.xlu1 %3065, %v3396_v22  }
  0x3c   : > { %3074 = vset.pattern.permute.xlu0 %v3094_v21 }
  0x3d   : > { %1974 = vperm.xlu0 %3074, %v1966_v7   ;;  %v2178_v7 = vld [vmem:[%s3905_s13 + $0x158] sm:$0x1] }
  0x3e   : > { %3067 = vset.pattern.permute.xlu1 %v3098_v36  ;;  %v2163_v36 = vld [vmem:[%s3905_s13 + $0xf8] sm:$0xff] }
  0x3f   : > { %1651 = vperm.xlu1 %3067, %v3396_v22  }
  0x43   : > { %3068 = vset.pattern.permute.xlu1 %v3099_v52  ;;  %v2922_v52 = vpack.c.bf16 %v2171_v48, %v2170_v47  ;;  %v2238_v47 = vld [vmem:[%s3905_s13 + $0x2c0] sm:$0xff]  ;;  %v2239_v48 = vld [vmem:[%s3905_s13 + $0x2c8] sm:$0xff] }
  0x44   : > { %1749 = vperm.xlu1 %3068, %v3389_v20  }
  0xf0   : > { %v670_v26 = vpop.f32.mrb[0].mxu0 }
  0xf1   : > { %v746_v27 = vpop.f32.mrb[0].mxu1  ;;  %v2457_v29 = vpop.f32.mrb[1].mxu0 }
  0xf2   : > { %v747_v30 = vadd.f32 %v746_v27, %v670_v26  ;;  %v2482_v31 = vpop.f32.mrb[1].mxu1  ;;  %v2146_v26 = vld [vmem:[%s3905_s13 + $0x88] sm:$0xff]  ;;  %v2147_v27 = vld [vmem:[%s3905_s13 + $0x90] sm:$0xff]  ;;  %v2160_v29 = vld [vmem:[%s3905_s13 + $0xe0] sm:$0xff] }
  0xf3   : > { %v2890_v31 = vpack.c.bf16 %v2147_v27, %v2146_v26  ;;  %v2982_v26 = vpack.c.bf16 %v2213_v18, %v2212_v17  ;;  %v2214_v27 = vld [vmem:[%s3905_s13 + $0x230] sm:$0xff]  ;;  %v2134_v17 = vld [vmem:[%s3902_s10 + $0x2] ss:$0 sm:$0xff]  ;;  %v2104_v18 = vld [vmem:[%s3902_s10] ss:$0 sm:$0xff] }
  0xf4   : > { %v757_v37 = vadd.f32 %v2103_v28, %v747_v30  ;;  %v2906_v28 = vpack.c.bf16 %v2159_v24, %v2158_v23  ;;  %v2161_v30 = vld [vmem:[%s3905_s13 + $0xe8] sm:$0xff]  ;;  %v2200_v24 = vld [vmem:[%s3905_s13 + $0x1d8] sm:$0xff] }
  0xf5   : > { %v2910_v34 = vpack.c.bf16 %v2161_v30, %v2160_v29  ;;  %v2202_v30 = vld [vmem:[%s3905_s13 + $0x1e8] sm:$0xff] }
  0xf6   : > { %v3427_v39 = vmax.f32 %v757_v37, 0.0  ;;  %v2894_v37 = vpack.c.bf16 %v2149_v33, %v2148_v32  ;;  %v2216_v33 = vld [vmem:[%s3905_s13 + $0x240] sm:$0xff] }
  0xf8   : > { %2506 = vmatmul.mubr.msk.f32.vlgmr.msra.gmra.mrb[2].mxu0 %vm596_vm2, %v3427_v39  ;;  %2531 = vmatmul.mubr.msk.f32.vlgmr.msra.gmra.mrb[2].mxu1 %vm596_vm2, %v3427_v39 }
  0xf9   : > { %2845 = vmatpush3.bf16.msra.mxu0 %v2844_v38  ;;  %2861 = vmatpush3.bf16.msra.mxu1 %v2858_v19  ;;  %v2902_v19 = vpack.c.bf16 %v2157_v15, %v2156_v14  ;;  %v3102_v38 = vmov 7   ;;  %v2198_v15 = vld [vmem:[%s3905_s13 + $0x1c8] sm:$0xff] }
  0xfa   : > { %2846 = vmatprep.subr.bf16.mxu0 %v3091_v3  ;;  %2863 = vmatprep.subr.bf16.mxu1 %v2862_v42 }
  0xfb   : > { %2555 = vmatprep.mubr.msk.f32.mxu0 %vm3092_vm0, %v3093_v11  ;;  %2580 = vmatprep.mubr.msk.f32.mxu1 %vm596_vm2, %v3442_v45 }
  0xfc   : > { %3070 = vset.pattern.permute.xlu1 %v3102_v38 }
  0xfd   : > { %2848 = vmatpush3.bf16.msra.mxu0 %v2847_v46  ;;  %2865 = vmatpush3.bf16.msra.mxu1 %v2862_v42  ;;  %v2169_v42 = vld [vmem:[%s3905_s13 + $0x110] sm:$0xff] }
  0xfe   : > { %2849 = vmatprep.subr.bf16.mxu0 %v3091_v3  ;;  %2867 = vmatprep.subr.bf16.mxu1 %v2866_v49  ;;  %v2918_v46 = vpack.c.bf16 %v2169_v42, %v2168_v41 }
  0xff   : > { %1851 = vperm.xlu1 %3070, %v3389_v20   ;;  %v2164_v20 = vld [vmem:[%s3905_s13 + $0x100] sm:$0x1] }
 0x101   : > { %2851 = vmatpush3.bf16.msra.mxu0 %v2850_v53  ;;  %2869 = vmatpush3.bf16.msra.mxu1 %v2866_v49  ;;  %v2184_v49 = vld [vmem:[%s3905_s13 + $0x170] sm:$0xff]  ;;  %v2172_v53 = vld [vmem:[%s3905_s13 + $0x128] sm:$0xff] }
 0x102   : > { %2852 = vmatprep.subr.bf16.mxu0 %v3091_v3  ;;  %2871 = vmatprep.subr.bf16.mxu1 %v2870_v56  ;;  %v2942_v55 = vpack.c.bf16 %v2185_v50, %v2184_v49  ;;  %v2926_v57 = vpack.c.bf16 %v2173_v54, %v2172_v53  ;;  %v2998_v49 = vpack.c.bf16 %v2225_v44, %v2224_v43  ;;  %v2226_v50 = vld [vmem:[%s3905_s13 + $0x278] sm:$0xff] }
 0x103   : > { %1855 = vperm.xlu1 %3070, %v3396_v22   ;;  %v2241_v53 = vld [vmem:[%s3905_s13 + $0x2d8] sm:$0xff]  ;;  %v3018_v54 = vpack.c.bf16 %v2239_v48, %v2238_v47 }
 0x105   : > { %2854 = vmatpush3.bf16.msra.mxu0 %v2853_v60  ;;  %2873 = vmatpush3.bf16.msra.mxu1 %v2870_v56  ;;  %v2187_v56 = vld [vmem:[%s3905_s13 + $0x188] sm:$0xff] }
 0x106   : > { %2855 = vmatprep.subr.bf16.mxu0 %v3091_v3  ;;  %2875 = vmatprep.subr.bf16.mxu1 %v2874_v63  ;;  %v2155_v3 = vld [vmem:[%s3905_s13 + $0xb8] sm:$0xff] }
 0x107   : > { %v2898_v13 = vpack.c.bf16 %v2155_v3, %v2154_v6  ;;  %3072 = vset.pattern.permute.xlu1 %v3101_v0  ;;  %v2930_v0 = vpack.c.bf16 %v2175_v59, %v2174_v58  ;;  %v2242_v58 = vld [vmem:[%s3905_s13 + $0x2e0] sm:$0xff]  ;;  %v2243_v59 = vld [vmem:[%s3905_s13 + $0x2e8] sm:$0xff] }
 0x108   : > { %1957 = vperm.xlu1 %3072, %v3396_v22   ;;  %v2186_v22 = vld [vmem:[%s3905_s13 + $0x180] sm:$0xff] }
 0x109   : > { %2857 = vmatpush3.bf16.msra.mxu0 %v2856_v1  ;;  %2877 = vmatpush3.bf16.msra.mxu1 %v2874_v63  ;;  %v2946_v60 = vpack.c.bf16 %v2187_v56, %v2186_v22  ;;  %v2189_v63 = vld [vmem:[%s3905_s13 + $0x198] sm:$0xff]  ;;  %v2176_v1 = vld [vmem:[%s3905_s13 + $0x148] sm:$0xff]  ;;  %v2229_v56 = vld [vmem:[%s3905_s13 + $0x290] sm:$0xff] }
 0x10a   : > { %2553 = vmatprep.subr.mxu0 %v3093_v11  ;;  %2578 = vmatprep.subr.msk.mxu1 %vm600_vm1, %v1051_v2  ;;  %v2882_v11 = vpack.c.bf16 %v2143_v9, %v2142_v8  ;;  %v2950_v4 = vpack.c.bf16 %v2189_v63, %v2188_v62  ;;  %v2196_v8 = vld [vmem:[%s3905_s13 + $0x1b8] sm:$0xff]  ;;  %v2197_v9 = vld [vmem:[%s3905_s13 + $0x1c0] sm:$0xff]  ;;  %v2228_v22 = vld [vmem:[%s3905_s13 + $0x288] sm:$0xff]  ;;  %v3026_v63 = vpack.c.bf16 %v2243_v59, %v2242_v58 }
 0x10b   : > { %v2958_v14 = vpack.c.bf16 %v2197_v9, %v2196_v8  ;;  %v2231_v62 = vld [vmem:[%s3905_s13 + $0x2a0] sm:$0xff]  ;;  %v2234_v9 = vld [vmem:[%s3905_s13 + $0x2b8] sm:$0x1] }
 0x10c   : > { %3073 = vset.pattern.permute.xlu1 %v3094_v21  ;;  %v2191_v21 = vld [vmem:[%s3905_s13 + $0x1a8] sm:$0xff] }
 0x10d   : > { %2554 = vmatpush3.msk.msra.mxu0 %vm600_vm1, %v2132_v10  ;;  %2579 = vmatpush3.msk.msra.mxu1 %vm600_vm1, %v1051_v2  ;;  %v2177_v2 = vld [vmem:[%s3905_s13 + $0x150] sm:$0xff]  ;;  %v2954_v3 = vpack.c.bf16 %v2191_v21, %v2190_v5 }
 0x10e   : > { %2556 = vmatmul.mubr.msk.f32.vlgmr.msra.gmra.mrb[4].mxu0 %vm596_vm2, %v3427_v39  ;;  %2879 = vmatprep.subr.bf16.mxu0 %v2878_v12  ;;  %v2914_v39 = vpack.c.bf16 %v2163_v36, %v2162_v35  ;;  %v2934_v6 = vpack.c.bf16 %v2177_v2, %v2176_v1  ;;  %v2192_v10 = vld [vmem:[%s3905_s13 + $0x1b0] sm:$0x1]  ;;  %v2204_v36 = vld [vmem:[%s3905_s13 + $0x1f8] sm:$0xff] }
 0x10f   : > { %2881 = vmatpush3.bf16.msra.mxu0 %v2878_v12  ;;  %2899 = vmatprep.subr.bf16.mxu1 %v2898_v13  ;;  %v2210_v12 = vld [vmem:[%s3905_s13 + $0x210] sm:$0xff]  ;;  %v2245_v1 = vld [vmem:[%s3905_s13 + $0x2f8] sm:$0xff] }
 0x110   : > { %2581 = vmatmul.mubr.msk.f32.vlgmr.msra.gmra.mrb[4].mxu1 %vm596_vm2, %v3532_v16  ;;  %2883 = vmatprep.subr.bf16.mxu0 %v2882_v11  ;;  %v2233_v5 = vld [vmem:[%s3905_s13 + $0x2b0] sm:$0xff] }
 0x111   : > { %2901 = vmatpush3.bf16.msra.mxu1 %v2898_v13  ;;  %2605 = vmatprep.mubr.msk.f32.mxu0 %vm596_vm2, %v3442_v45  ;;  %v2211_v13 = vld [vmem:[%s3905_s13 + $0x218] sm:$0xff] }
 0x112   : > { %2903 = vmatprep.subr.bf16.mxu1 %v2902_v19  ;;  %2630 = vmatprep.mubr.msk.f32.mxu1 %vm596_vm2, %v3442_v45 }
 0x113   : > { %2885 = vmatpush3.bf16.msra.mxu0 %v2882_v11  ;;  %1969 = vperm.xlu1 %3073, %v1965_v61   ;;  %v2199_v11 = vld [vmem:[%s3905_s13 + $0x1d0] sm:$0xff]  ;;  %v2230_v61 = vld [vmem:[%s3905_s13 + $0x298] sm:$0xff] }
 0x114   : > { %2887 = vmatprep.subr.bf16.mxu0 %v2886_v25  ;;  %v2962_v23 = vpack.c.bf16 %v2199_v11, %v2198_v15  ;;  %v3010_v2 = vpack.c.bf16 %v2231_v62, %v2230_v61  ;;  %v2119_v11 = vld [vmem:[%s3902_s10 + $0x1] ss:$0 sm:$0xff] }
 0x115   : > { %2905 = vmatpush3.bf16.msra.mxu1 %v2902_v19  ;;  %v2978_v19 = vpack.c.bf16 %v2211_v13, %v2210_v12 }
 0x116   : > { %2907 = vmatprep.subr.bf16.mxu1 %v2906_v28 }
 0x117   : > { %2889 = vmatpush3.bf16.msra.mxu0 %v2886_v25  ;;  %v2201_v25 = vld [vmem:[%s3905_s13 + $0x1e0] sm:$0xff] }
 0x118   : > { %2891 = vmatprep.subr.bf16.mxu0 %v2890_v31  ;;  %v2966_v29 = vpack.c.bf16 %v2201_v25, %v2200_v24 }
 0x119   : > { %2909 = vmatpush3.bf16.msra.mxu1 %v2906_v28  ;;  %v2215_v28 = vld [vmem:[%s3905_s13 + $0x238] sm:$0xff] }
 0x11a   : > { %2911 = vmatprep.subr.bf16.mxu1 %v2910_v34  ;;  %v2986_v32 = vpack.c.bf16 %v2215_v28, %v2214_v27 }
 0x11b   : > { %2893 = vmatpush3.bf16.msra.mxu0 %v2890_v31  ;;  %v2203_v31 = vld [vmem:[%s3905_s13 + $0x1f0] sm:$0xff] }
 0x11c   : > { %2895 = vmatprep.subr.bf16.mxu0 %v2894_v37  ;;  %v2970_v35 = vpack.c.bf16 %v2203_v31, %v2202_v30 }
 0x11d   : > { %2913 = vmatpush3.bf16.msra.mxu1 %v2910_v34  ;;  %v2217_v34 = vld [vmem:[%s3905_s13 + $0x248] sm:$0xff] }
 0x11e   : > { %2915 = vmatprep.subr.bf16.mxu1 %v2914_v39  ;;  %v2990_v38 = vpack.c.bf16 %v2217_v34, %v2216_v33 }
 0x11f   : > { %2897 = vmatpush3.bf16.msra.mxu0 %v2894_v37  ;;  %v2205_v37 = vld [vmem:[%s3905_s13 + $0x200] sm:$0xff] }
 0x120   : > { %2603 = vmatprep.subr.msk.mxu0 %vm600_vm1, %v2150_v40  ;;  %v2974_v41 = vpack.c.bf16 %v2205_v37, %v2204_v36  ;;  %v1240_v37 = vpop.permute.xlu1 %1239 }
 0x121   : > { %2917 = vmatpush3.bf16.msra.mxu1 %v2914_v39  ;;  %v2218_v39 = vld [vmem:[%s3905_s13 + $0x250] sm:$0xff] }
 0x122   : > { %2628 = vmatprep.subr.msk.mxu1 %vm600_vm1, %v2164_v20 }
 0x123   : > { %2604 = vmatpush3.msk.msra.mxu0 %vm600_vm1, %v2150_v40  ;;  %v2219_v40 = vld [vmem:[%s3905_s13 + $0x258] sm:$0xff] }
 0x124   : > { %2606 = vmatmul.mubr.msk.f32.vlgmr.msra.gmra.mrb[6].mxu0 %vm596_vm2, %v3532_v16  ;;  %2919 = vmatprep.subr.bf16.mxu0 %v2918_v46  ;;  %v2994_v42 = vpack.c.bf16 %v2219_v40, %v2218_v39  ;;  %v1244_v39 = vpop.permute.xlu1 %1243 }
 0x125   : > { %2629 = vmatpush3.msk.msra.mxu1 %vm600_vm1, %v2164_v20  ;;  %2921 = vmatpush3.bf16.msra.mxu0 %v2918_v46  ;;  %v2206_v20 = vld [vmem:[%s3905_s13 + $0x208] sm:$0x1]  ;;  %v2220_v46 = vld [vmem:[%s3905_s13 + $0x260] sm:$0x1] }
 0x126   : > { %2939 = vmatprep.subr.bf16.mxu1 %v2938_v51  ;;  %2631 = vmatmul.mubr.msk.f32.vlgmr.msra.gmra.mrb[6].mxu1 %vm596_vm2, %v3532_v16 }
 0x127   : > { %2941 = vmatpush3.bf16.msra.mxu1 %v2938_v51  ;;  %2923 = vmatprep.subr.bf16.mxu0 %v2922_v52  ;;  %v2227_v51 = vld [vmem:[%s3905_s13 + $0x280] sm:$0xff] }
 0x128   : > { %2943 = vmatprep.subr.bf16.mxu1 %v2942_v55  ;;  %2655 = vmatprep.mubr.msk.f32.mxu0 %vm596_vm2, %v3442_v45  ;;  %v1346_v43 = vpop.permute.xlu1 %1345 }
 0x129   : > { %2925 = vmatpush3.bf16.msra.mxu0 %v2922_v52  ;;  %2680 = vmatprep.mubr.msk.f32.mxu1 %vm596_vm2, %v3442_v45  ;;  %v2240_v52 = vld [vmem:[%s3905_s13 + $0x2d0] sm:$0xff] }
 0x12a   : > { %2927 = vmatprep.subr.bf16.mxu0 %v2926_v57 }
 0x12b   : > { %2945 = vmatpush3.bf16.msra.mxu1 %v2942_v55  ;;  %v3002_v55 = vpack.c.bf16 %v2227_v51, %v2226_v50 }
 0x12c   : > { %2947 = vmatprep.subr.bf16.mxu1 %v2946_v60  ;;  %v1444_v61 = vpop.permute.xlu1 %1443 }
 0x12d   : > { %2929 = vmatpush3.bf16.msra.mxu0 %v2926_v57  ;;  %v3022_v57 = vpack.c.bf16 %v2241_v53, %v2240_v52 }
 0x12e   : > { %2931 = vmatprep.subr.bf16.mxu0 %v2930_v0 }
 0x12f   : > { %2949 = vmatpush3.bf16.msra.mxu1 %v2946_v60  ;;  %v3006_v60 = vpack.c.bf16 %v2229_v56, %v2228_v22 }
 0x130   : > { %2951 = vmatprep.subr.bf16.mxu1 %v2950_v4  ;;  %v1546_v62 = vpop.permute.xlu1 %1545 }
 0x131   : > { %2933 = vmatpush3.bf16.msra.mxu0 %v2930_v0  ;;  %v2244_v0 = vld [vmem:[%s3905_s13 + $0x2f0] sm:$0xff] }
 0x132   : > { %2935 = vmatprep.subr.bf16.mxu0 %v2934_v6  ;;  %v3030_v21 = vpack.c.bf16 %v2245_v1, %v2244_v0 }
 0x133   : > { %2953 = vmatpush3.bf16.msra.mxu1 %v2950_v4  ;;  %v2232_v4 = vld [vmem:[%s3905_s13 + $0x2a8] sm:$0xff] }
 0x134   : > { %2955 = vmatprep.subr.bf16.mxu1 %v2954_v3  ;;  %v1550_v1 = vpop.permute.xlu1 %1549 }
 0x135   : > { %2937 = vmatpush3.bf16.msra.mxu0 %v2934_v6  ;;  %v2246_v6 = vld [vmem:[%s3905_s13 + $0x300] sm:$0xff] }
 0x136   : > { %2653 = vmatprep.subr.msk.mxu0 %vm600_vm1, %v2178_v7 }
 0x137   : > { %2957 = vmatpush3.bf16.msra.mxu1 %v2954_v3  ;;  %v2247_v3 = vld [vmem:[%s3905_s13 + $0x308] sm:$0xff] }
 0x138   : > { %2678 = vmatprep.subr.msk.mxu1 %vm600_vm1, %v2192_v10  ;;  %v3034_v8 = vpack.c.bf16 %v2247_v3, %v2246_v6 }
 0x139   : > { %2654 = vmatpush3.msk.msra.mxu0 %vm600_vm1, %v2178_v7  ;;  %v3014_v7 = vpack.c.bf16 %v2233_v5, %v2232_v4 }
 0x13a   : > { %2656 = vmatmul.mubr.msk.f32.vlgmr.msra.gmra.mrb[8].mxu0 %vm596_vm2, %v3532_v16  ;;  %2959 = vmatprep.subr.bf16.mxu0 %v2958_v14 }
 0x13b   : > { %2679 = vmatpush3.msk.msra.mxu1 %vm600_vm1, %v2192_v10  ;;  %2961 = vmatpush3.bf16.msra.mxu0 %v2958_v14  ;;  %v2248_v10 = vld [vmem:[%s3905_s13 + $0x310] sm:$0x1] }
 0x13c   : > { %2979 = vmatprep.subr.bf16.mxu1 %v2978_v19  ;;  %2681 = vmatmul.mubr.msk.f32.vlgmr.msra.gmra.mrb[8].mxu1 %vm596_vm2, %v3532_v16 }
 0x13d   : > { %2981 = vmatpush3.bf16.msra.mxu1 %v2978_v19  ;;  %2963 = vmatprep.subr.bf16.mxu0 %v2962_v23 }
 0x13e   : > { %2983 = vmatprep.subr.bf16.mxu1 %v2982_v26  ;;  %2705 = vmatprep.mubr.msk.f32.mxu0 %vm596_vm2, %v3442_v45 }
 0x13f   : > { %2965 = vmatpush3.bf16.msra.mxu0 %v2962_v23  ;;  %2730 = vmatprep.mubr.msk.f32.mxu1 %vm596_vm2, %v3442_v45 }
 0x140   : > { %2967 = vmatprep.subr.bf16.mxu0 %v2966_v29 }
 0x141   : > { %2985 = vmatpush3.bf16.msra.mxu1 %v2982_v26 }
 0x142   : > { %2987 = vmatprep.subr.bf16.mxu1 %v2986_v32 }
 0x143   : > { %2969 = vmatpush3.bf16.msra.mxu0 %v2966_v29 }
 0x144   : > { %2971 = vmatprep.subr.bf16.mxu0 %v2970_v35 }
 0x145   : > { %2989 = vmatpush3.bf16.msra.mxu1 %v2986_v32 }
 0x146   : > { %2991 = vmatprep.subr.bf16.mxu1 %v2990_v38 }
 0x147   : > { %2973 = vmatpush3.bf16.msra.mxu0 %v2970_v35 }
 0x148   : > { %2975 = vmatprep.subr.bf16.mxu0 %v2974_v41 }
 0x149   : > { %2993 = vmatpush3.bf16.msra.mxu1 %v2990_v38  ;;  %v1139_v38 = vpop.permute.xlu0 %1138 }
 0x14a   : > { %2995 = vmatprep.subr.bf16.mxu1 %v2994_v42 }
 0x14b   : > { %2977 = vmatpush3.bf16.msra.mxu0 %v2974_v41 }
 0x14c   : > { %2703 = vmatprep.subr.msk.mxu0 %vm600_vm1, %v2206_v20 }
 0x14d   : > { %2997 = vmatpush3.bf16.msra.mxu1 %v2994_v42  ;;  %v1144_v40 = vpop.permute.xlu0 %1143 }
 0x14e   : > { %2728 = vmatprep.subr.msk.mxu1 %vm600_vm1, %v2220_v46 }
 0x14f   : > { %2704 = vmatpush3.msk.msra.mxu0 %vm600_vm1, %v2206_v20 }
 0x150   : > { %2706 = vmatmul.mubr.msk.f32.vlgmr.msra.gmra.mrb[10].mxu0 %vm596_vm2, %v3532_v16  ;;  %2999 = vmatprep.subr.bf16.mxu0 %v2998_v49 }
 0x151   : > { %2729 = vmatpush3.msk.msra.mxu1 %vm600_vm1, %v2220_v46  ;;  %3001 = vmatpush3.bf16.msra.mxu0 %v2998_v49  ;;  %v1342_v49 = vpop.permute.xlu0 %1341 }
 0x152   : > { %3019 = vmatprep.subr.bf16.mxu1 %v3018_v54  ;;  %2731 = vmatmul.mubr.msk.f32.vlgmr.msra.gmra.mrb[10].mxu1 %vm596_vm2, %v3532_v16 }
 0x153   : > { %3021 = vmatpush3.bf16.msra.mxu1 %v3018_v54  ;;  %3003 = vmatprep.subr.bf16.mxu0 %v3002_v55 }
 0x154   : > { %3023 = vmatprep.subr.bf16.mxu1 %v3022_v57  ;;  %2755 = vmatprep.mubr.msk.f32.mxu0 %vm596_vm2, %v3442_v45 }
 0x155   : > { %3005 = vmatpush3.bf16.msra.mxu0 %v3002_v55  ;;  %2780 = vmatprep.mubr.msk.f32.mxu1 %vm596_vm2, %v3442_v45 }
 0x156   : > { %3007 = vmatprep.subr.bf16.mxu0 %v3006_v60 }
 0x157   : > { %3025 = vmatpush3.bf16.msra.mxu1 %v3022_v57 }
 0x158   : > { %3027 = vmatprep.subr.bf16.mxu1 %v3026_v63 }
 0x159   : > { %3009 = vmatpush3.bf16.msra.mxu0 %v3006_v60 }
 0x15a   : > { %3011 = vmatprep.subr.bf16.mxu0 %v3010_v2 }
 0x15b   : > { %3029 = vmatpush3.bf16.msra.mxu1 %v3026_v63  ;;  %v1448_v63 = vpop.permute.xlu0 %1447 }
 0x15c   : > { %3031 = vmatprep.subr.bf16.mxu1 %v3030_v21 }
 0x15d   : > { %3013 = vmatpush3.bf16.msra.mxu0 %v3010_v2 }
 0x15e   : > { %3015 = vmatprep.subr.bf16.mxu0 %v3014_v7 }
 0x15f   : > { %3033 = vmatpush3.bf16.msra.mxu1 %v3030_v21 }
 0x160   : > { %3035 = vmatprep.subr.bf16.mxu1 %v3034_v8 }
 0x161   : > { %3017 = vmatpush3.bf16.msra.mxu0 %v3014_v7 }
 0x162   : > { %2753 = vmatprep.subr.msk.mxu0 %vm600_vm1, %v2234_v9 }
 0x163   : > { %3037 = vmatpush3.bf16.msra.mxu1 %v3034_v8 }
 0x164   : > { %2778 = vmatprep.subr.msk.mxu1 %vm600_vm1, %v2248_v10 }
 0x165   : > { %2754 = vmatpush3.msk.msra.mxu0 %vm600_vm1, %v2234_v9 }
 0x166   : > { %2756 = vmatmul.mubr.msk.f32.vlgmr.msra.gmra.mrb[12].mxu0 %vm596_vm2, %v3532_v16 }
 0x167   : > { %2779 = vmatpush3.msk.msra.mxu1 %vm600_vm1, %v2248_v10 }
 0x168   : > { %2781 = vmatmul.mubr.msk.f32.vlgmr.msra.gmra.mrb[12].mxu1 %vm596_vm2, %v3532_v16 }
 0x1cb   : > { %v849_v12 = vpop.f32.mrb[2].mxu0  ;;  %v942_v13 = vpop.f32.mrb[2].mxu1 }
 0x1cc   : > { %v2507_v14 = vpop.f32.mrb[3].mxu0  ;;  %v2532_v15 = vpop.f32.mrb[3].mxu1  ;;  %v943_v23 = vadd.f32 %v2119_v11, %v942_v13  ;;  %v850_v27 = vadd.f32 %v2104_v18, %v849_v12 }
 0x1cd   : > { %v1648_v13 = vpop.permute.xlu0 %1647  ;;  %v1652_v14 = vpop.permute.xlu1 %1651 }
 0x1d1   : > { %v1754_v11 = vpop.permute.xlu0 %1753 }
 0x1e1   : > { %v1035_v19 = vpop.f32.mrb[4].mxu0 }
 0x1e2   : > { %v1036_v24 = vadd.f32 %v2134_v17, %v1035_v19  ;;  %v2557_v25 = vpop.f32.mrb[5].mxu0  ;;  %v1750_v19 = vpop.permute.xlu1 %1749 }
 0x1e3   : > { %v2582_v26 = vpop.f32.mrb[4].mxu1 }
 0x1e4   : > { %v1987_v28 = vmax.f32 %v943_v23, %v1036_v24  ;;  %v1127_v29 = vpop.f32.mrb[5].mxu1  ;;  %v1147_v46 = vmul.f32 %v2582_v26, %v1144_v40  ;;  %v2095_v40 = vld [vmem:[%s3894_s2 + $0x2] ss:$0 sm:$0xff] }
 0x1e5   : > { %v1146_v51 = vmul.f32 %v1139_v38, %v1127_v29 }
 0x1e6   : > { %v1988_v30 = vmax.f32 %v850_v27, %v1987_v28 }
 0x1e8   : > { %v1989_v31 = vsub.f32 %v850_v27, %v1988_v30  ;;  %v1992_v32 = vsub.f32 %v943_v23, %v1988_v30  ;;  %v1995_v33 = vsub.f32 %v1036_v24, %v1988_v30 }
 0x1ea   : > { %v1990_v34 = vmul.f32 1.442695, %v1989_v31  ;;  %v1993_v35 = vmul.f32 1.442695, %v1992_v32  ;;  %v1996_v36 = vmul.f32 1.442695, %v1995_v33  ;;  %v1852_v32 = vpop.permute.xlu1 %1851 }
 0x1ec   : > { %3075 = vpow2.f32 %v1990_v34  ;;  %v2094_v34 = vld [vmem:[%s3894_s2 + $0x1] ss:$0 sm:$0xff] }
 0x1ed   : > { %3077 = vpow2.f32 %v1993_v35  ;;  %v1954_v35 = vpop.permute.xlu0 %1953  ;;  %v526_v38 = vmul.f32 %v2094_v34, %v3442_v45 }
 0x1ee   : > { %3079 = vpow2.f32 %v1996_v36  ;;  %v1856_v33 = vpop.permute.xlu1 %1855 }
 0x1f2   : > { %v1958_v36 = vpop.permute.xlu1 %1957 }
 0x1f6   : > { %v3847_v41 = vpop.eup %3075 }
 0x1f7   : > { %v3849_v42 = vpop.eup %3077  ;;  %v2607_v20 = vpop.f32.mrb[6].mxu0 }
 0x1f8   : > { %v2013_v44 = vadd.f32 %v3849_v42, %v3847_v41  ;;  %v1247_v47 = vmul.f32 %v2607_v20, %v1244_v39  ;;  %v1229_v48 = vpop.f32.mrb[7].mxu0  ;;  %v3853_v50 = vpop.eup %3079  ;;  %v527_v39 = vmul.f32 %v2094_v34, %v3532_v16 }
 0x1f9   : > { %v1246_v52 = vmul.f32 %v1240_v37, %v1229_v48  ;;  %v2632_v53 = vpop.f32.mrb[6].mxu1 }
 0x1fa   : > { %v3856_v54 = vadd.f32 %v3853_v50, %v2013_v44  ;;  %v1249_v55 = vadd.f32 %v1247_v47, %v1147_v46  ;;  %v1349_v22 = vmul.f32 %v2632_v53, %v1346_v43  ;;  %v1331_v56 = vpop.f32.mrb[7].mxu1 }
 0x1fb   : > { %v1248_v57 = vadd.f32 %v1246_v52, %v1146_v51  ;;  %v1348_v58 = vmul.f32 %v1342_v49, %v1331_v56  ;;  %v541_v51 = vmul.f32 %v2095_v40, %v3442_v45  ;;  %v542_v52 = vmul.f32 %v2095_v40, %v3532_v16  ;;  %v2093_v56 = vld [vmem:[%s3894_s2] ss:$0 sm:$0xff] }
 0x1fc   : > { %v1351_v59 = vadd.f32 %v1349_v22, %v1249_v55  ;;  %v1975_v22 = vpop.permute.xlu0 %1974  ;;  %3081 = vrcp.f32 %v3856_v54  ;;  %v2096_v54 = vld [vmem:[%s3895_s3] ss:$0 sm:$0xff] }
 0x1fd   : > { %v1350_v60 = vadd.f32 %v1348_v58, %v1248_v57  ;;  %v531_v57 = vrot.slane %v526_v38, 1  ;;  %v532_v58 = vrot.slane %v527_v39, 1 }
 0x1ff   : > { %v533_v16 = vsel %vm530_vm3, %v531_v57, %v532_v58 }
 0x20d   : > { %v2657_v0 = vpop.f32.mrb[8].mxu0 }
 0x20e   : > { %v1451_v2 = vmul.f32 %v2657_v0, %v1448_v63  ;;  %v1433_v4 = vpop.f32.mrb[9].mxu0  ;;  %v520_v0 = vmul.f32 %v2093_v56, %v3442_v45 }
 0x20f   : > { %v1450_v5 = vmul.f32 %v1444_v61, %v1433_v4  ;;  %v2682_v21 = vpop.f32.mrb[8].mxu1  ;;  %v2252_v61 = vld [vmem:[%s3906_s14] ss:$0 sm:$0xff] }
 0x210   : > { %v1453_v6 = vadd.f32 %v1451_v2, %v1351_v59  ;;  %v1553_v3 = vmul.f32 %v2682_v21, %v1550_v1  ;;  %v1535_v7 = vpop.f32.mrb[9].mxu1  ;;  %v546_v1 = vrot.slane %v541_v51, 2  ;;  %v547_v2 = vrot.slane %v542_v52, 2 }
 0x211   : > { %v1452_v8 = vadd.f32 %v1450_v5, %v1350_v60  ;;  %v1552_v9 = vmul.f32 %v1546_v62, %v1535_v7  ;;  %v1970_v60 = vpop.permute.xlu1 %1969  ;;  %v535_v7 = vadd.f32 %v533_v16, %v520_v0 }
 0x212   : > { %v1555_v10 = vadd.f32 %v1553_v3, %v1453_v6 }
 0x213   : > { %v1554_v12 = vadd.f32 %v1552_v9, %v1452_v8  ;;  %v548_v8 = vsel %vm545_vm4, %v546_v1, %v547_v2 }
 0x223   : > { %v2707_v15 = vpop.f32.mrb[10].mxu0 }
 0x224   : > { %v1655_v17 = vmul.f32 %v2707_v15, %v1652_v14  ;;  %v1637_v18 = vpop.f32.mrb[11].mxu0  ;;  %v550_v14 = vadd.f32 %v548_v8, %v535_v7 }
 0x225   : > { %v1654_v23 = vmul.f32 %v1648_v13, %v1637_v18  ;;  %v2732_v24 = vpop.f32.mrb[10].mxu1 }
 0x226   : > { %v1657_v25 = vadd.f32 %v1655_v17, %v1555_v10  ;;  %v1757_v26 = vmul.f32 %v2732_v24, %v1754_v11  ;;  %v1739_v27 = vpop.f32.mrb[11].mxu1  ;;  %v558_v18 = vadd.f32 %v2096_v54, %v550_v14 }
 0x227   : > { %v1656_v28 = vadd.f32 %v1654_v23, %v1554_v12  ;;  %v1756_v29 = vmul.f32 %v1750_v19, %v1739_v27  ;;  %v3082_v23 = vpop.eup %3081 }
 0x228   : > { %v1759_v30 = vadd.f32 %v1757_v26, %v1657_v25 }
 0x229   : > { %v1758_v31 = vadd.f32 %v1756_v29, %v1656_v28 }
 0x239   : > { %v2757_v37 = vpop.f32.mrb[12].mxu0 }
 0x23a   : > { %v1859_v20 = vmul.f32 %v2757_v37, %v1856_v33  ;;  %v1841_v43 = vpop.f32.mrb[13].mxu0 }
 0x23b   : > { %v1858_v44 = vmul.f32 %v1852_v32, %v1841_v43  ;;  %v2782_v46 = vpop.f32.mrb[12].mxu1 }
 0x23c   : > { %v1861_v47 = vadd.f32 %v1859_v20, %v1759_v30  ;;  %v1961_v48 = vmul.f32 %v2782_v46, %v1958_v36  ;;  %v1943_v49 = vpop.f32.mrb[13].mxu1 }
 0x23d   : > { %v1860_v53 = vadd.f32 %v1858_v44, %v1758_v31  ;;  %v1960_v55 = vmul.f32 %v1954_v35, %v1943_v49 }
 0x23e   : > { %v1963_v59 = vadd.f32 %v1961_v48, %v1861_v47 }
 0x23f   : > { %v1962_v62 = vadd.f32 %v1960_v55, %v1860_v53 }
 0x240   : > { %v1978_v63 = vadd.f32 %v1975_v22, %v1963_v59 }
 0x241   : > { %v1977_v4 = vadd.f32 %v1970_v60, %v1962_v62 }
 0x242   : > { %v1986_v5 = vmul.f32 %v2252_v61, %v1978_v63 }
 0x243   : > { %v1985_v21 = vmul.f32 %v2252_v61, %v1977_v4 }
 0x244   : > { %v2002_v6 = vrot.slane %v1986_v5, 1  ;;  %v2008_v3 = vrot.slane %v1986_v5, 2 }
 0x245   : > { %v1998_v9 = vmul.f32 %v3847_v41, %v1985_v21  ;;  %v2001_v10 = vrot.slane %v1985_v21, 1  ;;  %v2007_v45 = vrot.slane %v1985_v21, 2 }
 0x247   : > { %v2003_v12 = vsel %vm530_vm3, %v2001_v10, %v2002_v6  ;;  %v2009_v13 = vsel %vm545_vm4, %v2007_v45, %v2008_v3 }
 0x248   : > { %v2005_v15 = vmul.f32 %v3849_v42, %v2003_v12  ;;  %v2011_v11 = vmul.f32 %v3853_v50, %v2009_v13 }
 0x24a   : > { %v2006_v17 = vadd.f32 %v2005_v15, %v1998_v9 }
 0x24c   : > { %v2012_v19 = vadd.f32 %v2011_v11, %v2006_v17 }
 0x24e   : > { %v2016_v41 = vmul.f32 %v3082_v23, %v2012_v19 }
 0x250   : > { %v2017_v24 = vadd.f32 %v2016_v41, %v558_v18 }
 0x252   : > { %2018 = vst.msk [vmem:[%s512_s27] sm:$0xff] %vm596_vm2, %v2017_v24 }
 0x253 PF: > { %s25_s18 = sadd.s32 1, %s3089_s18  }
 0x254   : > { %p22_p4 = scmp.ge.s32.totalorder %s25_s18, 4  }
 0x256   :  { %24 = sbr.rel (!%p22_p4) target bundleno = 1 (0x1), region = 127 }

</bundles_post_ra>
